<compile_context>
chip_gen: v6e
topology: v6e:2x2x1
jax: 0.10.0
libtpu: 0.0.40
codegen_flags: <defaults>
</compile_context>

<pallas_src>
import functools

import jax
import jax.numpy as jnp
from jax import lax
from jax.experimental import pallas as pl
from jax.experimental.pallas import tpu as pltpu

_NEG_BIG = -1e30  # finite stand-in for -inf (no inf-inf NaNs under Mosaic)


def _round_up(x, m):
    return ((x + m - 1) // m) * m


def _prenorm_pad(x, b_pad, d_pad, scale, out_dtype):
    """L2-normalize rows (F.normalize, eps=1e-12), scale, cast, zero-pad.

    One fused XLA pass: reads `x` once in its original dtype, writes the
    padded normalized tensor once (bf16 on the fast path).  Padded rows stay
    exactly zero, so their logits are exactly zero inside the kernel.
    """
    b, d = x.shape
    x32 = x.astype(jnp.float32)
    ssq = jnp.sum(x32 * x32, axis=1, keepdims=True)
    xn = x32 * (lax.rsqrt(jnp.maximum(ssq, 1e-24)) * scale)
    return jnp.pad(xn.astype(out_dtype), ((0, b_pad - b), (0, d_pad - d)))


def _pick_tiles(batch, d_pad, in_bytes):
    """Row tile t_q / column tile t_k (t_k is a multiple of t_q).

    Prefers one wide column tile (no online-softmax loop) when the pipelined
    working set fits a conservative budget sized for v7x's 64 MiB VMEM;
    otherwise widens t_k in powers of two.
    """
    t_q = 256 if batch >= 1024 else 128
    bq = _round_up(batch, t_q)
    budget = 20 * 1024 * 1024

    def fits(tk):
        need = (2 * t_q * d_pad * in_bytes      # anchor block (double-buffered)
                + 2 * tk * d_pad * in_bytes     # positive block (double-buffered)
                + 2 * t_q * tk * 4              # logits / exp temporaries
                + 32 * t_q)                     # per-row scratch + output
        return need <= budget

    if fits(bq):
        return t_q, bq
    t_k = t_q
    for mult in (2, 4, 8, 16):
        cand = t_q * mult
        if cand >= bq or not fits(cand):
            break
        t_k = cand
    return t_q, t_k


def _infonce_kernel(a_ref, p_ref, loss_ref, m_sc, l_sc, neg_sc, corr_sc, *,
                    hard_negative_mining, b_actual, b_padded, t_q, t_k):
    q = pl.program_id(0)
    k = pl.program_id(1)

    @pl.when(k == 0)
    def _init():
        m_sc[...] = jnp.full_like(m_sc, _NEG_BIG)
        l_sc[...] = jnp.zeros_like(l_sc)
        neg_sc[...] = jnp.full_like(neg_sc, _NEG_BIG)
        corr_sc[...] = jnp.zeros_like(corr_sc)

    # Inputs are pre-normalized and 1/temperature is folded into the anchor:
    # this NT contraction yields the logits tile directly (f32 MXU accum,
    # no transpose, no per-step normalization / temperature scaling).
    logits = lax.dot_general(a_ref[...], p_ref[...],
                             dimension_numbers=(((1,), (1,)), ((), ())),
                             preferred_element_type=jnp.float32)

    if b_padded != b_actual:
        # Padded positive rows are exactly zero -> logits exactly 0 there;
        # knock them out with a cheap (1, t_k) additive bias (O(t_k) iota/cmp
        # + one broadcast add).  Static branch: zero cost when B is aligned.
        col = k * t_k + lax.broadcasted_iota(jnp.int32, (1, t_k), 1)
        logits = logits + jnp.where(col < b_actual, 0.0, _NEG_BIG)

    # Online logsumexp; row_max is reused for the hard-negative running max on
    # off-diagonal tiles (one cross-lane reduce per step instead of two).
    row_max = jnp.max(logits, axis=1, keepdims=True)
    m_prev = m_sc[...]
    m_new = jnp.maximum(m_prev, row_max)
    alpha = jnp.exp(m_prev - m_new)
    l_sc[...] = alpha * l_sc[...] + jnp.sum(jnp.exp(logits - m_new),
                                            axis=1, keepdims=True)
    m_sc[...] = m_new

    # Does this (q, k) tile intersect the global diagonal?  (t_q and t_k may
    # differ, so this is an interval-overlap test, not q == k.)
    has_diag = jnp.logical_and(q * t_q < (k + 1) * t_k,
                               k * t_k < (q + 1) * t_q)

    @pl.when(has_diag)
    def _diag():
        r = q * t_q + lax.broadcasted_iota(jnp.int32, (t_q, t_k), 0)
        c = k * t_k + lax.broadcasted_iota(jnp.int32, (t_q, t_k), 1)
        on_diag = r == c
        # Correct-class logit straight from the already-computed logits tile
        # (consistent with the logsumexp path; no extra O(t_q*Dp) re-dot).
        corr_sc[...] = corr_sc[...] + jnp.sum(
            jnp.where(on_diag, logits, 0.0), axis=1, keepdims=True)
        if hard_negative_mining:
            masked = jnp.where(on_diag, _NEG_BIG, logits)
            neg_sc[...] = jnp.maximum(neg_sc[...],
                                      jnp.max(masked, axis=1, keepdims=True))

    if hard_negative_mining:
        @pl.when(jnp.logical_not(has_diag))
        def _offdiag():
            neg_sc[...] = jnp.maximum(neg_sc[...], row_max)

    @pl.when(k == pl.num_programs(1) - 1)
    def _finalize():
        m = m_sc[...]
        l = l_sc[...]
        if hard_negative_mining:
            mn = neg_sc[...]
            m_f = jnp.maximum(m, mn)
            lse = m_f + jnp.log(l * jnp.exp(m - m_f) + jnp.exp(mn - m_f))
        else:
            lse = m + jnp.log(l)
        loss_ref[...] = lse - corr_sc[...]


def infonce_loss(anchor, positive, *, temperature=0.07,
                 hard_negative_mining=True, use_bf16_matmul=True,
                 block_q=None, block_k=None):
    """InfoNCE loss: cosine similarity / T, optional hard-negative mining,
    mean cross-entropy against the diagonal (matches the PyTorch module)."""
    batch, dim = anchor.shape
    assert positive.shape == (batch, dim)

    in_dtype = jnp.bfloat16 if use_bf16_matmul else jnp.float32
    in_bytes = 2 if use_bf16_matmul else 4
    d_pad = _round_up(max(dim, 1), 128)

    if block_q is not None or block_k is not None:
        t_q = int(block_q) if block_q is not None else 128
        t_k = int(block_k) if block_k is not None else t_q
        assert t_q % 128 == 0 and t_k % t_q == 0, \
            "block_q must be 128-aligned and block_k a multiple of block_q"
    else:
        t_q, t_k = _pick_tiles(batch, d_pad, in_bytes)

    b_pad = _round_up(batch, t_k)       # multiple of both t_q and t_k
    inv_t = 1.0 / float(temperature)

    # Fused one-pass prologue: normalize, fold 1/T into anchor, cast, pad.
    a = _prenorm_pad(anchor, b_pad, d_pad, inv_t, in_dtype)
    p = _prenorm_pad(positive, b_pad, d_pad, 1.0, in_dtype)

    n_q = b_pad // t_q
    n_k = b_pad // t_k

    need = (2 * t_q * d_pad * in_bytes + 2 * t_k * d_pad * in_bytes
            + 2 * t_q * t_k * 4 + 32 * t_q)
    vmem_limit = int(min(64 * 1024 * 1024, max(32 * 1024 * 1024, 2 * need)))

    kernel = functools.partial(
        _infonce_kernel,
        hard_negative_mining=hard_negative_mining,
        b_actual=batch, b_padded=b_pad, t_q=t_q, t_k=t_k)

    per_row = pl.pallas_call(
        kernel,
        out_shape=jax.ShapeDtypeStruct((b_pad, 1), jnp.float32),
        grid_spec=pltpu.PrefetchScalarGridSpec(
            num_scalar_prefetch=0,
            grid=(n_q, n_k),
            in_specs=[
                pl.BlockSpec((t_q, d_pad), lambda i, j: (i, 0)),   # anchor rows
                pl.BlockSpec((t_k, d_pad), lambda i, j: (j, 0)),   # positive cols
            ],
            out_specs=pl.BlockSpec((t_q, 1), lambda i, j: (i, 0)),
            scratch_shapes=[pltpu.VMEM((t_q, 1), jnp.float32)
                            for _ in range(4)],
        ),
        compiler_params=pltpu.CompilerParams(
            dimension_semantics=("parallel", "arbitrary"),
            vmem_limit_bytes=vmem_limit),
    )(a, p)

    # Mean over the real batch outside the kernel (tiny lane work for XLA;
    # avoids an in-kernel cross-lane reduce and a (1,1) masked store).
    return jnp.mean(per_row[:batch, 0])


def _reference_loss(anchor, positive, temperature=0.07, hard_negative_mining=True):
    # pure-JAX reference mirroring the PyTorch module
    a = anchor / jnp.maximum(jnp.linalg.norm(anchor, axis=1, keepdims=True), 1e-12)
    p = positive / jnp.maximum(jnp.linalg.norm(positive, axis=1, keepdims=True), 1e-12)
    sim = jnp.matmul(a, p.T, precision=lax.Precision.HIGHEST)
    b = a.shape[0]
    if hard_negative_mining:
        neg = jnp.where(jnp.eye(b, dtype=bool), -jnp.inf, sim)
        max_neg = jnp.max(neg, axis=1, keepdims=True)
        sim = jnp.concatenate([sim, max_neg], axis=1)
    logits = sim / temperature
    lse = jax.scipy.special.logsumexp(logits, axis=1)
    return jnp.mean(lse - logits[jnp.arange(b), jnp.arange(b)])


if __name__ == "__main__":
    key = jax.random.PRNGKey(0)
    k1, k2, k3, k4 = jax.random.split(key, 4)

    # small demo shape (padded to 128x128 inside the wrapper)
    B, D = 8, 32
    anchor = jax.random.normal(k1, (B, D), dtype=jnp.float32)
    positive = jax.random.normal(k2, (B, D), dtype=jnp.float32)
    ref = _reference_loss(anchor, positive)

    # default fast path: bf16 MXU operands, f32 accumulation
    loss = jax.block_until_ready(infonce_loss(anchor, positive))
    assert jnp.allclose(loss, ref, rtol=5e-2, atol=5e-2), (loss, ref)

    # f32 operand path, tight tolerance
    loss32 = jax.block_until_ready(
        infonce_loss(anchor, positive, use_bf16_matmul=False))
    assert jnp.allclose(loss32, ref, rtol=2e-3, atol=2e-3), (loss32, ref)

    # no hard-negative-mining path
    loss_nh = jax.block_until_ready(
        infonce_loss(anchor, positive, hard_negative_mining=False,
                     use_bf16_matmul=False))
    ref_nh = _reference_loss(anchor, positive, hard_negative_mining=False)
    assert jnp.allclose(loss_nh, ref_nh, rtol=2e-3, atol=2e-3), (loss_nh, ref_nh)

    # non-aligned batch; forced small tiles exercise the multi-block online
    # softmax, off-diagonal hard-negative path and padded-column bias
    B2, D2 = 300, 40
    anchor2 = jax.random.normal(k3, (B2, D2), dtype=jnp.float32)
    positive2 = jax.random.normal(k4, (B2, D2), dtype=jnp.float32)
    ref2 = _reference_loss(anchor2, positive2)
    loss2 = jax.block_until_ready(
        infonce_loss(anchor2, positive2, use_bf16_matmul=False,
                     block_q=128, block_k=128))
    assert jnp.allclose(loss2, ref2, rtol=2e-3, atol=2e-3), (loss2, ref2)

    # default heuristic tiles (single wide column tile) + bf16 operands
    loss2_fast = jax.block_until_ready(infonce_loss(anchor2, positive2))
    assert jnp.allclose(loss2_fast, ref2, rtol=6e-2, atol=6e-2), (loss2_fast, ref2)

    print("KERNEL_OK")
</pallas_src>

<mosaic_0001>
module attributes {stable_mosaic.version = 11 : i64} {
  func.func @_infonce_kernel(%arg0: i32, %arg1: i32, %arg2: memref<128x128xbf16, #tpu.memory_space<vmem>>, %arg3: memref<128x128xbf16, #tpu.memory_space<vmem>>, %arg4: memref<128x1xf32, #tpu.memory_space<vmem>>, %arg5: memref<128x1xf32, #tpu.memory_space<vmem>>, %arg6: memref<128x1xf32, #tpu.memory_space<vmem>>, %arg7: memref<128x1xf32, #tpu.memory_space<vmem>>, %arg8: memref<128x1xf32, #tpu.memory_space<vmem>>) attributes {dimension_semantics = [#tpu.dimension_semantics<parallel>, #tpu.dimension_semantics<arbitrary>], iteration_bounds = array<i64: 1, 1>, scalar_prefetch = 0 : i64, scratch_operands = 4 : i64, tpu.core_type = #tpu.core_type<tc>, window_params = [{transform_indices = @transform_0, window_bounds = array<i64: 128, 128>}, {transform_indices = @transform_1, window_bounds = array<i64: 128, 128>}, {transform_indices = @transform_2, window_bounds = array<i64: 128, 1>}]} {
    %c0_i32 = arith.constant 0 : i32
    %0 = arith.cmpi eq, %arg1, %c0_i32 : i32
    %1 = arith.extui %0 : i1 to i32
    %c0_i32_0 = arith.constant 0 : i32
    %2 = arith.cmpi ne, %1, %c0_i32_0 : i32
    scf.if %2 {
      %cst_25 = arith.constant -1.000000e+30 : f32
      %50 = vector.broadcast %cst_25 : f32 to vector<128x1xf32>
      %c0_26 = arith.constant 0 : index
      %c0_27 = arith.constant 0 : index
      %51 = vector.load %arg5[%c0_26, %c0_27] : memref<128x1xf32, #tpu.memory_space<vmem>>, vector<128x1xf32>
      tpu.vector_store %arg5[%c0_26, %c0_27], %50 {strides = array<i32>} : memref<128x1xf32, #tpu.memory_space<vmem>>, vector<128x1xf32>,
      %cst_28 = arith.constant 0.000000e+00 : f32
      %52 = vector.broadcast %cst_28 : f32 to vector<128x1xf32>
      %c0_29 = arith.constant 0 : index
      %c0_30 = arith.constant 0 : index
      %53 = vector.load %arg6[%c0_29, %c0_30] : memref<128x1xf32, #tpu.memory_space<vmem>>, vector<128x1xf32>
      tpu.vector_store %arg6[%c0_29, %c0_30], %52 {strides = array<i32>} : memref<128x1xf32, #tpu.memory_space<vmem>>, vector<128x1xf32>,
      %cst_31 = arith.constant -1.000000e+30 : f32
      %54 = vector.broadcast %cst_31 : f32 to vector<128x1xf32>
      %c0_32 = arith.constant 0 : index
      %c0_33 = arith.constant 0 : index
      %55 = vector.load %arg7[%c0_32, %c0_33] : memref<128x1xf32, #tpu.memory_space<vmem>>, vector<128x1xf32>
      tpu.vector_store %arg7[%c0_32, %c0_33], %54 {strides = array<i32>} : memref<128x1xf32, #tpu.memory_space<vmem>>, vector<128x1xf32>,
      %cst_34 = arith.constant 0.000000e+00 : f32
      %56 = vector.broadcast %cst_34 : f32 to vector<128x1xf32>
      %c0_35 = arith.constant 0 : index
      %c0_36 = arith.constant 0 : index
      %57 = vector.load %arg8[%c0_35, %c0_36] : memref<128x1xf32, #tpu.memory_space<vmem>>, vector<128x1xf32>
      tpu.vector_store %arg8[%c0_35, %c0_36], %56 {strides = array<i32>} : memref<128x1xf32, #tpu.memory_space<vmem>>, vector<128x1xf32>,
    } else {
    }
    %c0 = arith.constant 0 : index
    %c0_1 = arith.constant 0 : index
    %3 = vector.load %arg2[%c0, %c0_1] : memref<128x128xbf16, #tpu.memory_space<vmem>>, vector<128x128xbf16>
    %c0_2 = arith.constant 0 : index
    %c0_3 = arith.constant 0 : index
    %4 = vector.load %arg3[%c0_2, %c0_3] : memref<128x128xbf16, #tpu.memory_space<vmem>>, vector<128x128xbf16>
    %cst = arith.constant dense<0.000000e+00> : vector<128x128xf32>
    %5 = tpu.matmul %3, %4, %cst {dimension_numbers = #tpu.dot_dimension_numbers<[1], [1], [0], [0], [0, 0, 1, 0], [], []>} : vector<128x128xbf16>, vector<128x128xbf16>, vector<128x128xf32> -> vector<128x128xf32>
    %c128_i32 = arith.constant 128 : i32
    %6 = arith.muli %arg1, %c128_i32 : i32
    %7 = tpu.iota {dimensions = array<i32: 1>} : vector<1x128xi32>
    %8 = vector.broadcast %6 : i32 to vector<1x128xi32>
    %9 = arith.addi %8, %7 : vector<1x128xi32>
    %c8_i32 = arith.constant 8 : i32
    %10 = vector.broadcast %c8_i32 : i32 to vector<1x128xi32>
    %11 = arith.cmpi slt, %9, %10 : vector<1x128xi32>
    %cst_4 = arith.constant 0.000000e+00 : f32
    %cst_5 = arith.constant -1.000000e+30 : f32
    %12 = vector.broadcast %cst_4 : f32 to vector<1x128xf32>
    %13 = vector.broadcast %cst_5 : f32 to vector<1x128xf32>
    %14 = arith.select %11, %12, %13 : vector<1x128xi1>, vector<1x128xf32>
    %15 = vector.broadcast %14 : vector<1x128xf32> to vector<128x128xf32>
    %16 = arith.addf %5, %15 : vector<128x128xf32>
    %cst_6 = arith.constant dense<0xFF800000> : vector<128xf32>
    %17 = vector.multi_reduction <maximumf>, %16, %cst_6 [1] : vector<128x128xf32> to vector<128xf32>
    %18 = vector.shape_cast %17 : vector<128xf32> to vector<128x1xf32>
    %c0_7 = arith.constant 0 : index
    %c0_8 = arith.constant 0 : index
    %19 = vector.load %arg5[%c0_7, %c0_8] : memref<128x1xf32, #tpu.memory_space<vmem>>, vector<128x1xf32>
    %20 = arith.maximumf %19, %18 : vector<128x1xf32>
    %21 = arith.subf %19, %20 : vector<128x1xf32>
    %22 = math.exp %21 : vector<128x1xf32>
    %c0_9 = arith.constant 0 : index
    %c0_10 = arith.constant 0 : index
    %23 = vector.load %arg6[%c0_9, %c0_10] : memref<128x1xf32, #tpu.memory_space<vmem>>, vector<128x1xf32>
    %24 = arith.mulf %22, %23 : vector<128x1xf32>
    %25 = vector.broadcast %20 : vector<128x1xf32> to vector<128x128xf32>
    %26 = arith.subf %16, %25 : vector<128x128xf32>
    %27 = math.exp %26 : vector<128x128xf32>
    %cst_11 = arith.constant dense<0.000000e+00> : vector<128xf32>
    %28 = vector.multi_reduction <add>, %27, %cst_11 [1] : vector<128x128xf32> to vector<128xf32>
    %29 = vector.shape_cast %28 : vector<128xf32> to vector<128x1xf32>
    %30 = arith.addf %24, %29 : vector<128x1xf32>
    %c0_12 = arith.constant 0 : index
    %c0_13 = arith.constant 0 : index
    %31 = vector.load %arg6[%c0_12, %c0_13] : memref<128x1xf32, #tpu.memory_space<vmem>>, vector<128x1xf32>
    tpu.vector_store %arg6[%c0_12, %c0_13], %30 {strides = array<i32>} : memref<128x1xf32, #tpu.memory_space<vmem>>, vector<128x1xf32>,
    %c0_14 = arith.constant 0 : index
    %c0_15 = arith.constant 0 : index
    %32 = vector.load %arg5[%c0_14, %c0_15] : memref<128x1xf32, #tpu.memory_space<vmem>>, vector<128x1xf32>
    tpu.vector_store %arg5[%c0_14, %c0_15], %20 {strides = array<i32>} : memref<128x1xf32, #tpu.memory_space<vmem>>, vector<128x1xf32>,
    %c128_i32_16 = arith.constant 128 : i32
    %33 = arith.muli %arg0, %c128_i32_16 : i32
    %c1_i32 = arith.constant 1 : i32
    %34 = arith.addi %arg1, %c1_i32 : i32
    %c128_i32_17 = arith.constant 128 : i32
    %35 = arith.muli %34, %c128_i32_17 : i32
    %36 = arith.cmpi slt, %33, %35 : i32
    %c128_i32_18 = arith.constant 128 : i32
    %37 = arith.muli %arg1, %c128_i32_18 : i32
    %c1_i32_19 = arith.constant 1 : i32
    %38 = arith.addi %arg0, %c1_i32_19 : i32
    %c128_i32_20 = arith.constant 128 : i32
    %39 = arith.muli %38, %c128_i32_20 : i32
    %40 = arith.cmpi slt, %37, %39 : i32
    %41 = arith.andi %36, %40 : i1
    %42 = arith.extui %41 : i1 to i32
    %c0_i32_21 = arith.constant 0 : i32
    %43 = arith.cmpi ne, %42, %c0_i32_21 : i32
    scf.if %43 {
      %c128_i32_25 = arith.constant 128 : i32
      %50 = arith.muli %arg0, %c128_i32_25 : i32
      %51 = tpu.iota {dimensions = array<i32: 0>} : vector<128x128xi32>
      %52 = vector.broadcast %50 : i32 to vector<128x128xi32>
      %53 = arith.addi %52, %51 : vector<128x128xi32>
      %c128_i32_26 = arith.constant 128 : i32
      %54 = arith.muli %arg1, %c128_i32_26 : i32
      %55 = tpu.iota {dimensions = array<i32: 1>} : vector<128x128xi32>
      %56 = vector.broadcast %54 : i32 to vector<128x128xi32>
      %57 = arith.addi %56, %55 : vector<128x128xi32>
      %58 = arith.cmpi eq, %53, %57 : vector<128x128xi32>
      %c0_27 = arith.constant 0 : index
      %c0_28 = arith.constant 0 : index
      %59 = vector.load %arg8[%c0_27, %c0_28] : memref<128x1xf32, #tpu.memory_space<vmem>>, vector<128x1xf32>
      %cst_29 = arith.constant 0.000000e+00 : f32
      %60 = vector.broadcast %cst_29 : f32 to vector<128x128xf32>
      %61 = arith.select %58, %16, %60 : vector<128x128xi1>, vector<128x128xf32>
      %cst_30 = arith.constant dense<0.000000e+00> : vector<128xf32>
      %62 = vector.multi_reduction <add>, %61, %cst_30 [1] : vector<128x128xf32> to vector<128xf32>
      %63 = vector.shape_cast %62 : vector<128xf32> to vector<128x1xf32>
      %64 = arith.addf %59, %63 : vector<128x1xf32>
      %c0_31 = arith.constant 0 : index
      %c0_32 = arith.constant 0 : index
      %65 = vector.load %arg8[%c0_31, %c0_32] : memref<128x1xf32, #tpu.memory_space<vmem>>, vector<128x1xf32>
      tpu.vector_store %arg8[%c0_31, %c0_32], %64 {strides = array<i32>} : memref<128x1xf32, #tpu.memory_space<vmem>>, vector<128x1xf32>,
      %cst_33 = arith.constant -1.000000e+30 : f32
      %66 = vector.broadcast %cst_33 : f32 to vector<128x128xf32>
      %67 = arith.select %58, %66, %16 : vector<128x128xi1>, vector<128x128xf32>
      %c0_34 = arith.constant 0 : index
      %c0_35 = arith.constant 0 : index
      %68 = vector.load %arg7[%c0_34, %c0_35] : memref<128x1xf32, #tpu.memory_space<vmem>>, vector<128x1xf32>
      %cst_36 = arith.constant dense<0xFF800000> : vector<128xf32>
      %69 = vector.multi_reduction <maximumf>, %67, %cst_36 [1] : vector<128x128xf32> to vector<128xf32>
      %70 = vector.shape_cast %69 : vector<128xf32> to vector<128x1xf32>
      %71 = arith.maximumf %68, %70 : vector<128x1xf32>
      %c0_37 = arith.constant 0 : index
      %c0_38 = arith.constant 0 : index
      %72 = vector.load %arg7[%c0_37, %c0_38] : memref<128x1xf32, #tpu.memory_space<vmem>>, vector<128x1xf32>
      tpu.vector_store %arg7[%c0_37, %c0_38], %71 {strides = array<i32>} : memref<128x1xf32, #tpu.memory_space<vmem>>, vector<128x1xf32>,
    } else {
    }
    %true = arith.constant true
    %44 = arith.xori %41, %true : i1
    %45 = arith.extui %44 : i1 to i32
    %c0_i32_22 = arith.constant 0 : i32
    %46 = arith.cmpi ne, %45, %c0_i32_22 : i32
    scf.if %46 {
      %c0_25 = arith.constant 0 : index
      %c0_26 = arith.constant 0 : index
      %50 = vector.load %arg7[%c0_25, %c0_26] : memref<128x1xf32, #tpu.memory_space<vmem>>, vector<128x1xf32>
      %51 = arith.maximumf %50, %18 : vector<128x1xf32>
      %c0_27 = arith.constant 0 : index
      %c0_28 = arith.constant 0 : index
      %52 = vector.load %arg7[%c0_27, %c0_28] : memref<128x1xf32, #tpu.memory_space<vmem>>, vector<128x1xf32>
      tpu.vector_store %arg7[%c0_27, %c0_28], %51 {strides = array<i32>} : memref<128x1xf32, #tpu.memory_space<vmem>>, vector<128x1xf32>,
    } else {
    }
    %c0_i32_23 = arith.constant 0 : i32
    %47 = arith.cmpi eq, %arg1, %c0_i32_23 : i32
    %48 = arith.extui %47 : i1 to i32
    %c0_i32_24 = arith.constant 0 : i32
    %49 = arith.cmpi ne, %48, %c0_i32_24 : i32
    scf.if %49 {
      %c0_25 = arith.constant 0 : index
      %c0_26 = arith.constant 0 : index
      %50 = vector.load %arg5[%c0_25, %c0_26] : memref<128x1xf32, #tpu.memory_space<vmem>>, vector<128x1xf32>
      %c0_27 = arith.constant 0 : index
      %c0_28 = arith.constant 0 : index
      %51 = vector.load %arg6[%c0_27, %c0_28] : memref<128x1xf32, #tpu.memory_space<vmem>>, vector<128x1xf32>
      %c0_29 = arith.constant 0 : index
      %c0_30 = arith.constant 0 : index
      %52 = vector.load %arg7[%c0_29, %c0_30] : memref<128x1xf32, #tpu.memory_space<vmem>>, vector<128x1xf32>
      %53 = arith.maximumf %50, %52 : vector<128x1xf32>
      %54 = arith.subf %50, %53 : vector<128x1xf32>
      %55 = math.exp %54 : vector<128x1xf32>
      %56 = arith.mulf %51, %55 : vector<128x1xf32>
      %57 = arith.subf %52, %53 : vector<128x1xf32>
      %58 = math.exp %57 : vector<128x1xf32>
      %59 = arith.addf %56, %58 : vector<128x1xf32>
      %60 = math.log %59 : vector<128x1xf32>
      %61 = arith.addf %53, %60 : vector<128x1xf32>
      %c0_31 = arith.constant 0 : index
      %c0_32 = arith.constant 0 : index
      %62 = vector.load %arg8[%c0_31, %c0_32] : memref<128x1xf32, #tpu.memory_space<vmem>>, vector<128x1xf32>
      %63 = arith.subf %61, %62 : vector<128x1xf32>
      %c0_33 = arith.constant 0 : index
      %c0_34 = arith.constant 0 : index
      %64 = vector.load %arg4[%c0_33, %c0_34] : memref<128x1xf32, #tpu.memory_space<vmem>>, vector<128x1xf32>
      tpu.vector_store %arg4[%c0_33, %c0_34], %63 {strides = array<i32>} : memref<128x1xf32, #tpu.memory_space<vmem>>, vector<128x1xf32>,
    } else {
    }
    return
  }
  func.func @transform_0(%arg0: i32, %arg1: i32) -> (i32, i32) {
    %c0_i32 = arith.constant 0 : i32
    %c0_i32_0 = arith.constant 0 : i32
    return %arg0, %c0_i32 : i32, i32
  }
  func.func @transform_1(%arg0: i32, %arg1: i32) -> (i32, i32) {
    %c0_i32 = arith.constant 0 : i32
    %c0_i32_0 = arith.constant 0 : i32
    return %arg1, %c0_i32 : i32, i32
  }
  func.func @transform_2(%arg0: i32, %arg1: i32) -> (i32, i32) {
    %c0_i32 = arith.constant 0 : i32
    %c0_i32_0 = arith.constant 0 : i32
    return %arg0, %c0_i32 : i32, i32
  }
}

</mosaic_0001>

<bundles_post_ra>
// kernel: tpu_custom_call.1
= control target key start
LH: loop header
LB: loop body
LE: loop exit
PB: predicated region body
PF: predicated region fallthrough
CT: control target
= control target key end

     0   :  { %7 = vsyncpa [#allocation7], 0  ;;  %s2461_s0 = inlined_call_operand.hbm [shape: bf16[128,128], index: 0, kind: input, shape index: {}]   ;;  %s2462_s1 = inlined_call_operand.hbm [shape: bf16[128,128], index: 1, kind: input, shape index: {}]   ;;  %s2463_s2 = inlined_call_operand.vmem [shape: f32[128,1], index: 2, kind: output, shape index: {}]  }
   0x1   :  { %8 = vsyncpa [#allocation9], 0  ;;  %s1604_s9 = smov [#allocation6]  }
   0x2   :  { %s14_s10 = sshll.u32 %s1604_s9, 4  ;;  %s15_s10 = int_to_ptr.vmem [resolvable:$true] %s14_s10 }
   0x3   :  { %s1568_s11 = scalar_lea.vmem %s15_s10, 1024  ;;  %p1573_p1 = scmp.lt.s32.totalorder %s15_s10, %s15_s10 }
   0x4   :  { %p1569_p0 = scmp.ne.s32.totalorder %s15_s10, %s1568_s11  ;;  %p1574_p2 = scmp.lt.s32.totalorder %s1568_s11, %s1568_s11 }
   0x6   :  { %p1575_p3 = por %p1574_p2, %p1573_p1 }
   0x8   :  { %p1576_p4 = pnand %p1575_p3, %p1569_p0 }
   0xa   :  { %1579 = shalt.err (!%p1576_p4)
}
   0xb   :  { %s1605_s12 = smov 64   ;;  %s1606_s13 = smov 4  }
   0xc   :  { %20 = dma.hbm_to_vmem [thread:$0]  %s2461_s0, 1024, %s15_s10, [#allocation7], %s1605_s12, %s1605_s12, %s1606_s13  }
   0xd   :  { %s1607_s16 = smov [#allocation8]  }
   0xe   :  { %s26_s17 = sshll.u32 %s1607_s16, 4  ;;  %s27_s17 = int_to_ptr.vmem [resolvable:$true] %s26_s17 }
   0xf   :  { %s1588_s18 = scalar_lea.vmem %s27_s17, 1024  ;;  %p1593_p6 = scmp.lt.s32.totalorder %s27_s17, %s27_s17 }
  0x10   :  { %p1589_p5 = scmp.ne.s32.totalorder %s27_s17, %s1588_s18  ;;  %p1594_p7 = scmp.lt.s32.totalorder %s1588_s18, %s1588_s18 }
  0x12   :  { %p1595_p8 = por %p1594_p7, %p1593_p6 }
  0x14   :  { %p1596_p9 = pnand %p1595_p8, %p1589_p5 }
  0x16   :  { %1599 = shalt.err (!%p1596_p9)
}
  0x17   :  { %32 = dma.hbm_to_vmem [thread:$0]  %s2462_s1, 1024, %s27_s17, [#allocation9], %s1605_s12, %s1605_s12, %s1606_s13  }
  0x18   :  { %1600 = dma.done.wait [#allocation7], 1024  }
  0x19   :  { %1601 = vsyncadd [#allocation7], 4294966272 }
  0x1a   :  { %1602 = dma.done.wait [#allocation9], 1024  }
  0x1b   :  { %1603 = vsyncadd [#allocation9], 4294966272  ;;  %v1384_v0 = vld [vmem:[#allocation8 + $0x38] sm:$0xff]   ;;  %v1385_v1 = vld [vmem:[#allocation8 + $0x30] sm:$0xff]   ;;  %vm44_vm0 = vcmask 7168   ;;  %v142_v17 = vlaneseq  ;;  %v1609_v44 = vmov 0  }
  0x1c   :  { %1327 = vmatprep.subr.bf16.mxu0 %v1384_v0  ;;  %1359 = vmatprep.subr.bf16.mxu1 %v1384_v0  ;;  %v1386_v2 = vld [vmem:[#allocation8 + $0x28] sm:$0xff]   ;;  %v1392_v3 = vld [vmem:[#allocation6] sm:$0xff]   ;;  %v1388_v6 = vld [vmem:[#allocation8 + $0x18] sm:$0xff]   ;;  %v1608_v16 = vmov -1e+30   ;;  %v1610_v55 = vmov 0.0  }
  0x1d   :  { %1328 = vmatpush3.bf16.xpose.msra.mxu0 %v1384_v0  ;;  %1367 = vmatpush3.bf16.xpose.msra.mxu1 %v1384_v0  ;;  %v1393_v4 = vld [vmem:[#allocation6 + $0x20] sm:$0xff]   ;;  %v1389_v7 = vld [vmem:[#allocation8 + $0x10] sm:$0xff]   ;;  %v1390_v8 = vld [vmem:[#allocation8 + $0x8] sm:$0xff]   ;;  %55 = vst.msk [vmem:[#allocation2 + $0x50] sm:$0xff] %vm44_vm0, %v1608_v16  ;;  %v1664_v18 = vand.u32 127, %v142_v17  ;;  %v1667_v19 = vshrl.u32 %v142_v17, 7 }
  0x1e   :  { %1329 = vmatprep.subr.bf16.mxu0 %v1385_v1  ;;  %1360 = vmatprep.subr.bf16.mxu1 %v1385_v1  ;;  %v1387_v5 = vld [vmem:[#allocation8 + $0x20] sm:$0xff]   ;;  %v1394_v10 = vld [vmem:[#allocation6 + $0x8] sm:$0xff]   ;;  %v1396_v12 = vld [vmem:[#allocation6 + $0x10] sm:$0xff]   ;;  %45 = vst.msk [vmem:[#allocation2] sm:$0xff] %vm44_vm0, %v1608_v16 }
  0x1f   :  { %1343 = vmatprep.mubr.bf16.mxu0 %v1392_v3  ;;  %1351 = vmatprep.mubr.bf16.mxu1 %v1393_v4  ;;  %v1391_v9 = vld [vmem:[#allocation8] sm:$0xff]   ;;  %v1395_v11 = vld [vmem:[#allocation6 + $0x28] sm:$0xff]   ;;  %v1398_v13 = vld [vmem:[#allocation6 + $0x30] sm:$0xff]   ;;  %46 = vst.msk [vmem:[#allocation2 + $0x8] sm:$0xff] %vm44_vm0, %v1608_v16  ;;  %vm146_vm1 = vcmp.lt.s32.totalorder %v1664_v18, 8  ;;  %v1670_v20 = vadd.s32 16, %v1667_v19  ;;  %vm739_vm3 = vcmp.eq.s32.totalorder %v1667_v19, %v1664_v18 }
  0x20   :  { %v1397_v14 = vld [vmem:[#allocation6 + $0x18] sm:$0xff]   ;;  %47 = vst.msk [vmem:[#allocation2 + $0x10] sm:$0xff] %vm44_vm0, %v1608_v16  ;;  %48 = vst.msk [vmem:[#allocation2 + $0x18] sm:$0xff] %vm44_vm0, %v1608_v16  ;;  %v1672_v21 = vsel %vm146_vm1, 0.0, %v1608_v16  ;;  %v1713_v41 = vadd.s32 8, %v1667_v19  ;;  %1382 = vset.pattern.permute.xlu1 %v1609_v44  ;;  %1383 = vset.pattern.permute.xlu0 %v1609_v44  ;;  %v1791_v59 = vadd.s32 32, %v1667_v19 }
  0x21   :  { %v1399_v15 = vld [vmem:[#allocation6 + $0x38] sm:$0xff]   ;;  %49 = vst.msk [vmem:[#allocation2 + $0x20] sm:$0xff] %vm44_vm0, %v1608_v16  ;;  %50 = vst.msk [vmem:[#allocation2 + $0x28] sm:$0xff] %vm44_vm0, %v1608_v16  ;;  %vm741_vm2 = vcmp.eq.s32.totalorder %v1670_v20, %v1664_v18  ;;  %v1800_v61 = vadd.s32 48, %v1667_v19  ;;  %v1809_v63 = vadd.s32 64, %v1667_v19  ;;  %v1827_v3 = vadd.s32 96, %v1667_v19 }
  0x22   :  { %51 = vst.msk [vmem:[#allocation2 + $0x30] sm:$0xff] %vm44_vm0, %v1608_v16  ;;  %52 = vst.msk [vmem:[#allocation2 + $0x38] sm:$0xff] %vm44_vm0, %v1608_v16  ;;  %vm740_vm4 = vcmp.eq.s32.totalorder %v1713_v41, %v1664_v18  ;;  %vm743_vm5 = vcmp.eq.s32.totalorder %v1791_v59, %v1664_v18 }
  0x23   :  { %53 = vst.msk [vmem:[#allocation2 + $0x40] sm:$0xff] %vm44_vm0, %v1608_v16  ;;  %54 = vst.msk [vmem:[#allocation2 + $0x48] sm:$0xff] %vm44_vm0, %v1608_v16  ;;  %vm745_vm6 = vcmp.eq.s32.totalorder %v1800_v61, %v1664_v18  ;;  %vm747_vm7 = vcmp.eq.s32.totalorder %v1809_v63, %v1664_v18  ;;  %vm751_vm9 = vcmp.eq.s32.totalorder %v1827_v3, %v1664_v18 }
  0x24   :  { %56 = vst.msk [vmem:[#allocation2 + $0x58] sm:$0xff] %vm44_vm0, %v1608_v16  ;;  %57 = vst.msk [vmem:[#allocation2 + $0x60] sm:$0xff] %vm44_vm0, %v1608_v16 }
  0x25   :  { %1330 = vmatpush3.bf16.xpose.msra.mxu0 %v1385_v1  ;;  %1368 = vmatpush3.bf16.xpose.msra.mxu1 %v1385_v1  ;;  %58 = vst.msk [vmem:[#allocation2 + $0x68] sm:$0xff] %vm44_vm0, %v1608_v16  ;;  %59 = vst.msk [vmem:[#allocation2 + $0x70] sm:$0xff] %vm44_vm0, %v1608_v16  ;;  %v1818_v1 = vadd.s32 80, %v1667_v19 }
  0x26   :  { %1331 = vmatprep.subr.bf16.mxu0 %v1386_v2  ;;  %1361 = vmatprep.subr.bf16.mxu1 %v1386_v2  ;;  %60 = vst.msk [vmem:[#allocation2 + $0x78] sm:$0xff] %vm44_vm0, %v1608_v16  ;;  %77 = vst.msk [vmem:[#allocation4] sm:$0xff] %vm44_vm0, %v1608_v16 }
  0x27   :  { %78 = vst.msk [vmem:[#allocation4 + $0x8] sm:$0xff] %vm44_vm0, %v1608_v16  ;;  %79 = vst.msk [vmem:[#allocation4 + $0x10] sm:$0xff] %vm44_vm0, %v1608_v16  ;;  %vm749_vm8 = vcmp.eq.s32.totalorder %v1818_v1, %v1664_v18 }
  0x28   :  { %80 = vst.msk [vmem:[#allocation4 + $0x18] sm:$0xff] %vm44_vm0, %v1608_v16  ;;  %81 = vst.msk [vmem:[#allocation4 + $0x20] sm:$0xff] %vm44_vm0, %v1608_v16 }
  0x29   :  { %82 = vst.msk [vmem:[#allocation4 + $0x28] sm:$0xff] %vm44_vm0, %v1608_v16  ;;  %83 = vst.msk [vmem:[#allocation4 + $0x30] sm:$0xff] %vm44_vm0, %v1608_v16 }
  0x2a   :  { %84 = vst.msk [vmem:[#allocation4 + $0x38] sm:$0xff] %vm44_vm0, %v1608_v16  ;;  %85 = vst.msk [vmem:[#allocation4 + $0x40] sm:$0xff] %vm44_vm0, %v1608_v16 }
  0x2b   :  { %86 = vst.msk [vmem:[#allocation4 + $0x48] sm:$0xff] %vm44_vm0, %v1608_v16  ;;  %87 = vst.msk [vmem:[#allocation4 + $0x50] sm:$0xff] %vm44_vm0, %v1608_v16 }
  0x2c   :  { %88 = vst.msk [vmem:[#allocation4 + $0x58] sm:$0xff] %vm44_vm0, %v1608_v16  ;;  %89 = vst.msk [vmem:[#allocation4 + $0x60] sm:$0xff] %vm44_vm0, %v1608_v16 }
  0x2d   :  { %1332 = vmatpush3.bf16.xpose.msra.mxu0 %v1386_v2  ;;  %1369 = vmatpush3.bf16.xpose.msra.mxu1 %v1386_v2  ;;  %90 = vst.msk [vmem:[#allocation4 + $0x68] sm:$0xff] %vm44_vm0, %v1608_v16  ;;  %91 = vst.msk [vmem:[#allocation4 + $0x70] sm:$0xff] %vm44_vm0, %v1608_v16 }
  0x2e   :  { %1333 = vmatprep.subr.bf16.mxu0 %v1387_v5  ;;  %1362 = vmatprep.subr.bf16.mxu1 %v1387_v5  ;;  %92 = vst.msk [vmem:[#allocation4 + $0x78] sm:$0xff] %vm44_vm0, %v1608_v16  ;;  %93 = vst.msk [vmem:[#allocation5] sm:$0xff] %vm44_vm0, %v1610_v55 }
  0x2f   :  { %61 = vst.msk [vmem:[#allocation3] sm:$0xff] %vm44_vm0, %v1610_v55  ;;  %62 = vst.msk [vmem:[#allocation3 + $0x8] sm:$0xff] %vm44_vm0, %v1610_v55 }
  0x30   :  { %63 = vst.msk [vmem:[#allocation3 + $0x10] sm:$0xff] %vm44_vm0, %v1610_v55  ;;  %64 = vst.msk [vmem:[#allocation3 + $0x18] sm:$0xff] %vm44_vm0, %v1610_v55  ;;  %v873_v17 = vld [vmem:[#allocation4 + $0x30] sm:$0xff] }
  0x31   :  { %65 = vst.msk [vmem:[#allocation3 + $0x20] sm:$0xff] %vm44_vm0, %v1610_v55  ;;  %66 = vst.msk [vmem:[#allocation3 + $0x28] sm:$0xff] %vm44_vm0, %v1610_v55 }
  0x32   :  { %67 = vst.msk [vmem:[#allocation3 + $0x30] sm:$0xff] %vm44_vm0, %v1610_v55  ;;  %68 = vst.msk [vmem:[#allocation3 + $0x38] sm:$0xff] %vm44_vm0, %v1610_v55 }
  0x33   :  { %69 = vst.msk [vmem:[#allocation3 + $0x40] sm:$0xff] %vm44_vm0, %v1610_v55  ;;  %70 = vst.msk [vmem:[#allocation3 + $0x48] sm:$0xff] %vm44_vm0, %v1610_v55 }
  0x34   :  { %71 = vst.msk [vmem:[#allocation3 + $0x50] sm:$0xff] %vm44_vm0, %v1610_v55  ;;  %72 = vst.msk [vmem:[#allocation3 + $0x58] sm:$0xff] %vm44_vm0, %v1610_v55 }
  0x35   :  { %1334 = vmatpush3.bf16.xpose.msra.mxu0 %v1387_v5  ;;  %1370 = vmatpush3.bf16.xpose.msra.mxu1 %v1387_v5  ;;  %73 = vst.msk [vmem:[#allocation3 + $0x60] sm:$0xff] %vm44_vm0, %v1610_v55  ;;  %74 = vst.msk [vmem:[#allocation3 + $0x68] sm:$0xff] %vm44_vm0, %v1610_v55  ;;  %v1836_v5 = vadd.s32 112, %v1667_v19  ;;  %v755_v61 = vld [vmem:[#allocation5] sm:$0xff] }
  0x36   :  { %1335 = vmatprep.subr.bf16.mxu0 %v1388_v6  ;;  %1363 = vmatprep.subr.bf16.mxu1 %v1388_v6  ;;  %75 = vst.msk [vmem:[#allocation3 + $0x70] sm:$0xff] %vm44_vm0, %v1610_v55  ;;  %76 = vst.msk [vmem:[#allocation3 + $0x78] sm:$0xff] %vm44_vm0, %v1610_v55 }
  0x37   :  { %94 = vst.msk [vmem:[#allocation5 + $0x8] sm:$0xff] %vm44_vm0, %v1610_v55  ;;  %95 = vst.msk [vmem:[#allocation5 + $0x10] sm:$0xff] %vm44_vm0, %v1610_v55  ;;  %vm753_vm10 = vcmp.eq.s32.totalorder %v1836_v5, %v1664_v18  ;;  %v870_v5 = vld [vmem:[#allocation4 + $0x18] sm:$0xff] }
  0x38   :  { %96 = vst.msk [vmem:[#allocation5 + $0x18] sm:$0xff] %vm44_vm0, %v1610_v55  ;;  %97 = vst.msk [vmem:[#allocation5 + $0x20] sm:$0xff] %vm44_vm0, %v1610_v55 }
  0x39   :  { %98 = vst.msk [vmem:[#allocation5 + $0x28] sm:$0xff] %vm44_vm0, %v1610_v55  ;;  %99 = vst.msk [vmem:[#allocation5 + $0x30] sm:$0xff] %vm44_vm0, %v1610_v55 }
  0x3a   :  { %100 = vst.msk [vmem:[#allocation5 + $0x38] sm:$0xff] %vm44_vm0, %v1610_v55  ;;  %101 = vst.msk [vmem:[#allocation5 + $0x40] sm:$0xff] %vm44_vm0, %v1610_v55 }
  0x3b   :  { %102 = vst.msk [vmem:[#allocation5 + $0x48] sm:$0xff] %vm44_vm0, %v1610_v55  ;;  %103 = vst.msk [vmem:[#allocation5 + $0x50] sm:$0xff] %vm44_vm0, %v1610_v55 }
  0x3c   :  { %104 = vst.msk [vmem:[#allocation5 + $0x58] sm:$0xff] %vm44_vm0, %v1610_v55  ;;  %105 = vst.msk [vmem:[#allocation5 + $0x60] sm:$0xff] %vm44_vm0, %v1610_v55 }
  0x3d   :  { %1336 = vmatpush3.bf16.xpose.msra.mxu0 %v1388_v6  ;;  %1371 = vmatpush3.bf16.xpose.msra.mxu1 %v1388_v6  ;;  %106 = vst.msk [vmem:[#allocation5 + $0x68] sm:$0xff] %vm44_vm0, %v1610_v55  ;;  %107 = vst.msk [vmem:[#allocation5 + $0x70] sm:$0xff] %vm44_vm0, %v1610_v55 }
  0x3e   :  { %1337 = vmatprep.subr.bf16.mxu0 %v1389_v7  ;;  %1364 = vmatprep.subr.bf16.mxu1 %v1389_v7  ;;  %108 = vst.msk [vmem:[#allocation5 + $0x78] sm:$0xff] %vm44_vm0, %v1610_v55  ;;  %v1908_v55 = vld [vmem:[#allocation2 + $0x8] sm:$0xff]  ;;  %v757_v1 = vld [vmem:[#allocation5 + $0x10] sm:$0xff] }
  0x45   :  { %1338 = vmatpush3.bf16.xpose.msra.mxu0 %v1389_v7  ;;  %1372 = vmatpush3.bf16.xpose.msra.mxu1 %v1389_v7 }
  0x46   :  { %1339 = vmatprep.subr.bf16.mxu0 %v1390_v8  ;;  %1365 = vmatprep.subr.bf16.mxu1 %v1390_v8 }
  0x4d   :  { %1340 = vmatpush3.bf16.xpose.msra.mxu0 %v1390_v8  ;;  %1373 = vmatpush3.bf16.xpose.msra.mxu1 %v1390_v8  ;;  %v1848_v8 = vld [vmem:[#allocation2 + $0x50] sm:$0xff] }
  0x4e   :  { %1341 = vmatprep.subr.bf16.mxu0 %v1391_v9  ;;  %1366 = vmatprep.subr.bf16.mxu1 %v1391_v9 }
  0x55   :  { %1342 = vmatpush3.bf16.xpose.msra.mxu0 %v1391_v9  ;;  %1374 = vmatpush3.bf16.xpose.msra.mxu1 %v1391_v9  ;;  %v1850_v9 = vld [vmem:[#allocation2 + $0x10] sm:$0xff] }
  0x5c   :  { %1344 = vmatmul.mubr.bf16.vlgmr.msra.gmra.mxu0 %v1394_v10  ;;  %1352 = vmatmul.mubr.bf16.vlgmr.msra.gmra.mxu1 %v1395_v11 }
  0x5d   :  { %1347 = vmatprep.mubr.bf16.mxu0 %v1396_v12  ;;  %1355 = vmatprep.mubr.bf16.mxu1 %v1398_v13 }
  0x64   :  { %1348 = vmatmul.mubr.bf16.gmra.mxu0 %v1397_v14  ;;  %1356 = vmatmul.mubr.bf16.gmra.mxu1 %v1399_v15  ;;  %v869_v14 = vld [vmem:[#allocation4 + $0x10] sm:$0xff]  ;;  %v867_v15 = vld [vmem:[#allocation4] sm:$0xff] }
 0x11c   :  { %v1345_v22 = vpop.f32.mrf.mxu0  ;;  %v1353_v23 = vpop.f32.mrf.mxu1 }
 0x11d   :  { %v1675_v24 = vadd.f32 %v1345_v22, %v1672_v21  ;;  %v1678_v25 = vadd.f32 %v1353_v23, %v1672_v21 }
 0x11e   :  { %v278_v26 = vpop.f32.mrf.mxu0  ;;  %v310_v27 = vpop.f32.mrf.mxu1 }
 0x11f   :  { %v1685_v28 = vadd.f32 %v278_v26, %v1672_v21  ;;  %361 = vmax.xlane.f32.xlu0 %v1678_v25  ;;  %345 = vmax.xlane.f32.xlu1 %v1675_v24  ;;  %v853_v30 = vsel %vm741_vm2, -1e+30, %v1675_v24  ;;  %v1705_v39 = vadd.f32 %v310_v27, %v1672_v21  ;;  %v861_v4 = vsel %vm749_vm8, -1e+30, %v1678_v25  ;;  %v1867_v27 = vld [vmem:[#allocation2] sm:$0xff] }
 0x120   :  { %v1346_v29 = vpop.f32.mrf.mxu0  ;;  %v1354_v32 = vpop.f32.mrf.mxu1 }
 0x121   :  { %v851_v31 = vsel %vm739_vm3, -1e+30, %v1685_v28  ;;  %v1698_v35 = vadd.f32 %v1346_v29, %v1672_v21  ;;  %v1708_v40 = vadd.f32 %v1354_v32, %v1672_v21  ;;  %v859_v2 = vsel %vm747_vm7, -1e+30, %v1705_v39  ;;  %v1869_v29 = vld [vmem:[#allocation2 + $0x18] sm:$0xff] }
 0x122   :  { %v281_v33 = vpop.f32.mrf.mxu0  ;;  %v313_v36 = vpop.f32.mrf.mxu1 }
 0x123   :  { %887 = vmax.xlane.f32.xlu0 %v853_v30  ;;  %883 = vmax.xlane.f32.xlu1 %v851_v31  ;;  %v1716_v45 = vadd.f32 %v281_v33, %v1672_v21  ;;  %v1719_v46 = vadd.f32 %v313_v36, %v1672_v21  ;;  %v1882_v36 = vld [vmem:[#allocation2 + $0x58] sm:$0xff] }
 0x124   :  { %v1349_v34 = vpop.f32.mrf.mxu0  ;;  %v1357_v38 = vpop.f32.mrf.mxu1 }
 0x125   :  { %v852_v49 = vsel %vm740_vm4, -1e+30, %v1716_v45  ;;  %v1733_v50 = vadd.f32 %v1349_v34, %v1672_v21  ;;  %v1740_v53 = vadd.f32 %v1357_v38, %v1672_v21  ;;  %v1880_v34 = vld [vmem:[#allocation2 + $0x40] sm:$0xff] }
 0x126   :  { %v1702_v37 = vpop.f32.mrf.mxu0  ;;  %v326_v43 = vpop.f32.mrf.mxu1  ;;  %v1989_v38 = vld [vmem:[#allocation2 + $0x60] sm:$0xff] }
 0x127   :  { %341 = vmax.xlane.f32.xlu0 %v1685_v28  ;;  %347 = vmax.xlane.f32.xlu1 %v1698_v35  ;;  %v1783_v57 = vadd.f32 %v1702_v37, %v1672_v21  ;;  %v1794_v60 = vadd.f32 %v326_v43, %v1672_v21  ;;  %v857_v0 = vsel %vm745_vm6, -1e+30, %v1733_v50  ;;  %v865_v7 = vsel %vm753_vm10, -1e+30, %v1740_v53  ;;  %2482 = vst [vmem:[#allocation20_spill] sm:$0xff] %v1989_v38  ;;  %v871_v37 = vld [vmem:[#allocation4 + $0x20] sm:$0xff] }
 0x128   :  { %v1350_v42 = vpop.f32.mrf.mxu0  ;;  %v1358_v48 = vpop.f32.mrf.mxu1 }
 0x129   :  { %v1724_v47 = vadd.f32 %v1350_v42, %v1672_v21  ;;  %v1737_v51 = vadd.f32 %v1358_v48, %v1672_v21  ;;  %v855_v62 = vsel %vm743_vm5, -1e+30, %v1783_v57  ;;  %v863_v6 = vsel %vm751_vm9, -1e+30, %v1794_v60 }
 0x12a   :  { %v297_v52 = vpop.f32.mrf.mxu0  ;;  %v329_v56 = vpop.f32.mrf.mxu1 }
 0x12b   :  { %357 = vmax.xlane.f32.xlu0 %v1705_v39  ;;  %363 = vmax.xlane.f32.xlu1 %v1708_v40  ;;  %v1745_v54 = vadd.f32 %v297_v52, %v1672_v21  ;;  %v1786_v58 = vadd.f32 %v329_v56, %v1672_v21  ;;  %v1910_v56 = vld [vmem:[#allocation2 + $0x48] sm:$0xff] }
 0x12f   :  { %343 = vmax.xlane.f32.xlu0 %v1716_v45  ;;  %359 = vmax.xlane.f32.xlu1 %v1719_v46 }
 0x133   :  { %885 = vmax.xlane.f32.xlu0 %v852_v49  ;;  %355 = vmax.xlane.f32.xlu1 %v1724_v47 }
 0x137   :  { %353 = vmax.xlane.f32.xlu0 %v1733_v50  ;;  %371 = vmax.xlane.f32.xlu1 %v1737_v51 }
 0x13b   :  { %369 = vmax.xlane.f32.xlu0 %v1740_v53  ;;  %351 = vmax.xlane.f32.xlu1 %v1745_v54 }
 0x13f   :  { %349 = vmax.xlane.f32.xlu0 %v1783_v57  ;;  %367 = vmax.xlane.f32.xlu1 %v1786_v58 }
 0x143   :  { %365 = vmax.xlane.f32.xlu0 %v1794_v60 }
 0x147   :  { %891 = vmax.xlane.f32.xlu0 %v855_v62 }
 0x14b   :  { %895 = vmax.xlane.f32.xlu0 %v857_v0 }
 0x14f   :  { %899 = vmax.xlane.f32.xlu0 %v859_v2 }
 0x153   :  { %903 = vmax.xlane.f32.xlu0 %v861_v4 }
 0x157   :  { %907 = vmax.xlane.f32.xlu0 %v863_v6  ;;  %v868_v6 = vld [vmem:[#allocation4 + $0x8] sm:$0xff] }
 0x15b   :  { %911 = vmax.xlane.f32.xlu0 %v865_v7  ;;  %v1919_v7 = vld [vmem:[#allocation2 + $0x38] sm:$0xff] }
 0x1a8   :  { %v362_v10 = vpop.xlane.xlu0 %361  ;;  %v346_v11 = vpop.xlane.xlu1 %345 }
 0x1a9   :  { %v1853_v12 = vmax.f32 %v1848_v8, %v362_v10  ;;  %v1856_v13 = vmax.f32 %v1850_v9, %v346_v11  ;;  %v1979_v11 = vld [vmem:[#allocation2 + $0x20] sm:$0xff] }
 0x1aa   :  { %2478 = vst [vmem:[#allocation16_spill] sm:$0xff] %v1979_v11 }
 0x1ab   :  { %688 = vst.msk [vmem:[#allocation2 + $0x50] sm:$0xff] %vm44_vm0, %v1853_v12  ;;  %680 = vst.msk [vmem:[#allocation2 + $0x10] sm:$0xff] %vm44_vm0, %v1856_v13  ;;  %497 = vperm.xlu1 %1382, %v1856_v13  }
 0x1ac   :  { %v888_v21 = vpop.xlane.xlu0 %887  ;;  %v884_v22 = vpop.xlane.xlu1 %883 }
 0x1ad   :  { %v917_v23 = vmax.f32 %v869_v14, %v888_v21  ;;  %v915_v26 = vmax.f32 %v867_v15, %v884_v22 }
 0x1af   :  { %933 = vst.msk [vmem:[#allocation4 + $0x10] sm:$0xff] %vm44_vm0, %v917_v23  ;;  %931 = vst.msk [vmem:[#allocation4] sm:$0xff] %vm44_vm0, %v915_v26  ;;  %537 = vperm.xlu1 %1382, %v1853_v12   ;;  %v1933_v23 = vld [vmem:[#allocation2 + $0x30] sm:$0xff]  ;;  %v1935_v26 = vld [vmem:[#allocation2 + $0x78] sm:$0xff] }
 0x1b0   :  { %v342_v30 = vpop.xlane.xlu0 %341  ;;  %v348_v31 = vpop.xlane.xlu1 %347 }
 0x1b1   :  { %v1875_v32 = vmax.f32 %v1867_v27, %v342_v30  ;;  %v1878_v33 = vmax.f32 %v1869_v29, %v348_v31 }
 0x1b3   :  { %678 = vst.msk [vmem:[#allocation2] sm:$0xff] %vm44_vm0, %v1875_v32  ;;  %681 = vst.msk [vmem:[#allocation2 + $0x18] sm:$0xff] %vm44_vm0, %v1878_v33  ;;  %487 = vperm.xlu0 %1383, %v1875_v32  }
 0x1b4   :  { %v358_v42 = vpop.xlane.xlu0 %357  ;;  %v364_v43 = vpop.xlane.xlu1 %363 }
 0x1b5   :  { %v1894_v44 = vmax.f32 %v1880_v34, %v358_v42  ;;  %v1897_v48 = vmax.f32 %v1882_v36, %v364_v43 }
 0x1b7   :  { %686 = vst.msk [vmem:[#allocation2 + $0x40] sm:$0xff] %vm44_vm0, %v1894_v44  ;;  %689 = vst.msk [vmem:[#allocation2 + $0x58] sm:$0xff] %vm44_vm0, %v1897_v48  ;;  %527 = vperm.xlu1 %1382, %v1894_v44  }
 0x1b8   :  { %v344_v62 = vpop.xlane.xlu0 %343  ;;  %v360_v0 = vpop.xlane.xlu1 %359 }
 0x1b9   :  { %v1913_v2 = vmax.f32 %v1908_v55, %v344_v62  ;;  %v1916_v4 = vmax.f32 %v1910_v56, %v360_v0  ;;  %v1950_v0 = vld [vmem:[#allocation2 + $0x70] sm:$0xff] }
 0x1ba   :  { %2474 = vst [vmem:[#allocation12_spill] sm:$0xff] %v1950_v0 }
 0x1bb   :  { %502 = vperm.xlu1 %1382, %v1878_v33   ;;  %679 = vst.msk [vmem:[#allocation2 + $0x8] sm:$0xff] %vm44_vm0, %v1913_v2  ;;  %687 = vst.msk [vmem:[#allocation2 + $0x48] sm:$0xff] %vm44_vm0, %v1916_v4  ;;  %532 = vperm.xlu0 %1383, %v1916_v4  }
 0x1bc   :  { %v886_v14 = vpop.xlane.xlu0 %885  ;;  %v356_v15 = vpop.xlane.xlu1 %355 }
 0x1bd   :  { %v916_v21 = vmax.f32 %v868_v6, %v886_v14  ;;  %v1931_v22 = vmax.f32 %v1919_v7, %v356_v15  ;;  %v1952_v6 = vld [vmem:[#allocation2 + $0x28] sm:$0xff] }
 0x1be   :  { %2475 = vst [vmem:[#allocation13_spill] sm:$0xff] %v1952_v6 }
 0x1bf   :  { %932 = vst.msk [vmem:[#allocation4 + $0x8] sm:$0xff] %vm44_vm0, %v916_v21  ;;  %492 = vperm.xlu1 %1382, %v1913_v2   ;;  %685 = vst.msk [vmem:[#allocation2 + $0x38] sm:$0xff] %vm44_vm0, %v1931_v22  ;;  %542 = vperm.xlu0 %1383, %v1897_v48  }
 0x1c0   :  { %v354_v31 = vpop.xlane.xlu0 %353  ;;  %v372_v42 = vpop.xlane.xlu1 %371 }
 0x1c1   :  { %v1945_v43 = vmax.f32 %v1933_v23, %v354_v31  ;;  %v1948_v62 = vmax.f32 %v1935_v26, %v372_v42 }
 0x1c3   :  { %684 = vst.msk [vmem:[#allocation2 + $0x30] sm:$0xff] %vm44_vm0, %v1945_v43  ;;  %693 = vst.msk [vmem:[#allocation2 + $0x78] sm:$0xff] %vm44_vm0, %v1948_v62  ;;  %517 = vperm.xlu1 %1382, %v1945_v43   ;;  %562 = vperm.xlu0 %1383, %v1948_v62  }
 0x1c4   :  { %v370_v21 = vpop.xlane.xlu0 %369  ;;  %v352_v31 = vpop.xlane.xlu1 %351 }
 0x1c5   :  { %v1965_v42 = vmax.f32 %v1950_v0, %v370_v21  ;;  %v1968_v14 = vmax.f32 %v1952_v6, %v352_v31  ;;  %v1981_v21 = vld [vmem:[#allocation2 + $0x68] sm:$0xff]  ;;  %v881_v6 = vld [vmem:[#allocation4 + $0x70] sm:$0xff] }
 0x1c6   :  { %2479 = vst [vmem:[#allocation17_spill] sm:$0xff] %v1981_v21 }
 0x1c7   :  { %2476 = vst [vmem:[#allocation14_spill] sm:$0xff] %v1965_v42  ;;  %2477 = vst [vmem:[#allocation15_spill] sm:$0xff] %v1968_v14  ;;  %557 = vperm.xlu1 %1382, %v1965_v42  }
 0x1c8   :  { %692 = vst.msk [vmem:[#allocation2 + $0x70] sm:$0xff] %vm44_vm0, %v1965_v42  ;;  %683 = vst.msk [vmem:[#allocation2 + $0x28] sm:$0xff] %vm44_vm0, %v1968_v14  ;;  %v350_v31 = vpop.xlane.xlu0 %349  ;;  %v368_v10 = vpop.xlane.xlu1 %367 }
 0x1c9   :  { %v1984_v52 = vmax.f32 %v1979_v11, %v350_v31  ;;  %v1987_v30 = vmax.f32 %v1981_v21, %v368_v10 }
 0x1cb   :  { %2480 = vst [vmem:[#allocation18_spill] sm:$0xff] %v1984_v52  ;;  %2481 = vst [vmem:[#allocation19_spill] sm:$0xff] %v1987_v30  ;;  %507 = vperm.xlu1 %1382, %v1984_v52   ;;  %552 = vperm.xlu0 %1383, %v1987_v30  }
 0x1cc   :  { %682 = vst.msk [vmem:[#allocation2 + $0x20] sm:$0xff] %vm44_vm0, %v1984_v52  ;;  %691 = vst.msk [vmem:[#allocation2 + $0x68] sm:$0xff] %vm44_vm0, %v1987_v30  ;;  %v366_v10 = vpop.xlane.xlu0 %365  ;;  %v877_v52 = vld [vmem:[#allocation4 + $0x50] sm:$0xff] }
 0x1cd   :  { %v2002_v31 = vmax.f32 %v1989_v38, %v366_v10  ;;  %v875_v10 = vld [vmem:[#allocation4 + $0x40] sm:$0xff] }
 0x1cf   :  { %2483 = vst [vmem:[#allocation21_spill] sm:$0xff] %v2002_v31  ;;  %690 = vst.msk [vmem:[#allocation2 + $0x60] sm:$0xff] %vm44_vm0, %v2002_v31  ;;  %547 = vperm.xlu1 %1382, %v2002_v31  }
 0x1d0   :  { %v892_v49 = vpop.xlane.xlu0 %891 }
 0x1d1   :  { %v919_v16 = vmax.f32 %v871_v37, %v892_v49  ;;  %v879_v37 = vld [vmem:[#allocation4 + $0x60] sm:$0xff] }
 0x1d3   :  { %935 = vst.msk [vmem:[#allocation4 + $0x20] sm:$0xff] %vm44_vm0, %v919_v16  ;;  %522 = vperm.xlu1 %1382, %v1931_v22  }
 0x1d4   :  { %v896_v30 = vpop.xlane.xlu0 %895 }
 0x1d5   :  { %v921_v21 = vmax.f32 %v873_v17, %v896_v30 }
 0x1d7   :  { %937 = vst.msk [vmem:[#allocation4 + $0x30] sm:$0xff] %vm44_vm0, %v921_v21  ;;  %512 = vperm.xlu1 %1382, %v1968_v14   ;;  %v2036_v21 = vadd.s32 56, %v1667_v19 }
 0x1d8   :  { %v900_v15 = vpop.xlane.xlu0 %899 }
 0x1d9   :  { %v923_v38 = vmax.f32 %v875_v10, %v900_v15  ;;  %v771_v15 = vsel %vm739_vm3, %v1685_v28, 0.0  ;;  %vm746_vm13 = vcmp.eq.s32.totalorder %v2036_v21, %v1664_v18 }
 0x1da   :  { %v858_v10 = vsel %vm746_vm13, -1e+30, %v1724_v47 }
 0x1db   :  { %939 = vst.msk [vmem:[#allocation4 + $0x40] sm:$0xff] %vm44_vm0, %v923_v38  ;;  %v773_v38 = vsel %vm741_vm2, %v1675_v24, 0.0 }
 0x1dc   :  { %v904_v31 = vpop.xlane.xlu0 %903 }
 0x1dd   :  { %v925_v11 = vmax.f32 %v877_v52, %v904_v31  ;;  %v709_v52 = vadd.s32 24, %v1667_v19  ;;  %v2045_v31 = vadd.s32 72, %v1667_v19 }
 0x1df   :  { %941 = vst.msk [vmem:[#allocation4 + $0x50] sm:$0xff] %vm44_vm0, %v925_v11  ;;  %vm742_vm11 = vcmp.eq.s32.totalorder %v709_v52, %v1664_v18  ;;  %v2028_v11 = vadd.s32 40, %v1667_v19  ;;  %vm748_vm14 = vcmp.eq.s32.totalorder %v2045_v31, %v1664_v18 }
 0x1e0   :  { %v908_v16 = vpop.xlane.xlu0 %907 }
 0x1e1   :  { %v927_v49 = vmax.f32 %v879_v37, %v908_v16  ;;  %vm744_vm12 = vcmp.eq.s32.totalorder %v2028_v11, %v1664_v18  ;;  %v2054_v37 = vadd.s32 88, %v1667_v19  ;;  %v860_v16 = vsel %vm748_vm14, -1e+30, %v1719_v46 }
 0x1e2   :  { %v856_v20 = vsel %vm744_vm12, -1e+30, %v1745_v54  ;;  %v780_v11 = vsel %vm748_vm14, %v1719_v46, 0.0 }
 0x1e3   :  { %943 = vst.msk [vmem:[#allocation4 + $0x60] sm:$0xff] %vm44_vm0, %v927_v49  ;;  %vm750_vm15 = vcmp.eq.s32.totalorder %v2054_v37, %v1664_v18  ;;  %v2063_v49 = vadd.s32 104, %v1667_v19 }
 0x1e4   :  { %v912_v17 = vpop.xlane.xlu0 %911 }
 0x1e5   :  { %v929_v30 = vmax.f32 %v881_v6, %v912_v17  ;;  %v854_v6 = vsel %vm742_vm11, -1e+30, %v1698_v35  ;;  %v862_v17 = vsel %vm750_vm15, -1e+30, %v1708_v40  ;;  %vm752_vm1 = vcmp.eq.s32.totalorder %v2063_v49, %v1664_v18 }
 0x1e7   :  { %945 = vst.msk [vmem:[#allocation4 + $0x70] sm:$0xff] %vm44_vm0, %v929_v30  ;;  %v2072_v30 = vadd.s32 120, %v1667_v19  ;;  %v772_v19 = vsel %vm740_vm4, %v1716_v45, 0.0 }
 0x1e9   :  { %vm754_vm2 = vcmp.eq.s32.totalorder %v2072_v30, %v1664_v18  ;;  %v880_v30 = vld [vmem:[#allocation4 + $0x68] sm:$0xff] }
 0x1ea   :  { %787 = vadd.xlane.f32.xlu0 %v771_v15  ;;  %v864_v15 = vsel %vm752_vm1, -1e+30, %v1786_v58 }
 0x1ee   :  { %791 = vadd.xlane.f32.xlu0 %v773_v38  ;;  %v866_v38 = vsel %vm754_vm2, -1e+30, %v1737_v51 }
 0x1fb   :  { %889 = vmax.xlane.f32.xlu1 %v854_v6  ;;  %v774_v6 = vsel %vm742_vm11, %v1698_v35, 0.0 }
 0x1ff   :  { %893 = vmax.xlane.f32.xlu1 %v856_v20 }
 0x203   :  { %897 = vmax.xlane.f32.xlu1 %v858_v10 }
 0x207   :  { %901 = vmax.xlane.f32.xlu1 %v860_v16 }
 0x20b   :  { %905 = vmax.xlane.f32.xlu1 %v862_v17 }
 0x20f   :  { %909 = vmax.xlane.f32.xlu1 %v864_v15 }
 0x213   :  { %913 = vmax.xlane.f32.xlu1 %v866_v38 }
 0x217   :  { %789 = vadd.xlane.f32.xlu1 %v772_v19 }
 0x21b   :  { %793 = vadd.xlane.f32.xlu1 %v774_v6 }
 0x226   :  { %v498_v20 = vpop.permute.xlu1 %497 }
 0x227   :  { %v567_v10 = vsub.f32 %v1675_v24, %v498_v20 }
 0x229   :  { %v585_v16 = vmul.f32 1.442695, %v567_v10 }
 0x22a   :  { %v538_v17 = vpop.permute.xlu1 %537 }
 0x22b   :  { %1400 = vpow2.f32 %v585_v16  ;;  %v575_v15 = vsub.f32 %v1678_v25, %v538_v17 }
 0x22d   :  { %v601_v38 = vmul.f32 1.442695, %v575_v15 }
 0x22e   :  { %v488_v14 = vpop.permute.xlu0 %487 }
 0x22f   :  { %1402 = vpow2.f32 %v601_v38  ;;  %v565_v41 = vsub.f32 %v1685_v28, %v488_v14 }
 0x231   :  { %v581_v42 = vmul.f32 1.442695, %v565_v41 }
 0x232   :  { %v528_v19 = vpop.permute.xlu1 %527 }
 0x233   :  { %1404 = vpow2.f32 %v581_v42  ;;  %v573_v52 = vsub.f32 %v1705_v39, %v528_v19 }
 0x235   :  { %v597_v0 = vmul.f32 1.442695, %v573_v52 }
 0x236   :  { %v503_v6 = vpop.permute.xlu1 %502  ;;  %v533_v20 = vpop.permute.xlu0 %532 }
 0x237   :  { %1406 = vpow2.f32 %v597_v0  ;;  %v568_v24 = vsub.f32 %v1698_v35, %v503_v6  ;;  %v574_v35 = vsub.f32 %v1719_v46, %v533_v20  ;;  %v786_v46 = vsel %vm754_vm2, %v1737_v51, 0.0 }
 0x238   :  { %v1401_v10 = vpop.eup %1400 }
 0x239   :  { %v587_v16 = vmul.f32 1.442695, %v568_v24  ;;  %617 = vadd.xlane.f32.xlu0 %v1401_v10 }
 0x23a   :  { %v493_v17 = vpop.permute.xlu1 %492  ;;  %v543_v15 = vpop.permute.xlu0 %542 }
 0x23b   :  { %1408 = vpow2.f32 %v587_v16  ;;  %v566_v28 = vsub.f32 %v1716_v45, %v493_v17  ;;  %v576_v14 = vsub.f32 %v1708_v40, %v543_v15  ;;  %v599_v45 = vmul.f32 1.442695, %v574_v35 }
 0x23c   :  { %v1403_v38 = vpop.eup %1402 }
 0x23d   :  { %633 = vadd.xlane.f32.xlu0 %v1403_v38  ;;  %v603_v42 = vmul.f32 1.442695, %v576_v14  ;;  %v583_v52 = vmul.f32 1.442695, %v566_v28 }
 0x23e   :  { %v518_v41 = vpop.permute.xlu1 %517 }
 0x23f   :  { %v571_v19 = vsub.f32 %v1733_v50, %v518_v41  ;;  %1410 = vpow2.f32 %v603_v42 }
 0x240   :  { %v1405_v0 = vpop.eup %1404 }
 0x241   :  { %v593_v6 = vmul.f32 1.442695, %v571_v19  ;;  %613 = vadd.xlane.f32.xlu0 %v1405_v0  ;;  %v563_v19 = vpop.permute.xlu0 %562 }
 0x242   :  { %v558_v24 = vpop.permute.xlu1 %557 }
 0x243   :  { %1412 = vpow2.f32 %v593_v6  ;;  %v579_v10 = vsub.f32 %v1740_v53, %v558_v24  ;;  %v580_v6 = vsub.f32 %v1737_v51, %v563_v19 }
 0x244   :  { %v1407_v16 = vpop.eup %1406  ;;  %1414 = vpow2.f32 %v583_v52 }
 0x245   :  { %v609_v17 = vmul.f32 1.442695, %v579_v10  ;;  %629 = vadd.xlane.f32.xlu0 %v1407_v16 }
 0x246   :  { %v508_v15 = vpop.permute.xlu1 %507 }
 0x247   :  { %1416 = vpow2.f32 %v609_v17  ;;  %v569_v14 = vsub.f32 %v1783_v57, %v508_v15  ;;  %v611_v15 = vmul.f32 1.442695, %v580_v6 }
 0x248   :  { %v1409_v38 = vpop.eup %1408  ;;  %1418 = vpow2.f32 %v599_v45 }
 0x249   :  { %619 = vadd.xlane.f32.xlu1 %v1409_v38  ;;  %v589_v20 = vmul.f32 1.442695, %v569_v14 }
 0x24a   :  { %v548_v28 = vpop.permute.xlu1 %547 }
 0x24b   :  { %1420 = vpow2.f32 %v589_v20  ;;  %v577_v42 = vsub.f32 %v1794_v60, %v548_v28  ;;  %v553_v20 = vpop.permute.xlu0 %552 }
 0x24c   :  { %v1411_v41 = vpop.eup %1410  ;;  %v578_v28 = vsub.f32 %v1786_v58, %v553_v20 }
 0x24d   :  { %v605_v0 = vmul.f32 1.442695, %v577_v42  ;;  %635 = vadd.xlane.f32.xlu1 %v1411_v41 }
 0x24e   :  { %v523_v35 = vpop.permute.xlu1 %522  ;;  %v607_v19 = vmul.f32 1.442695, %v578_v28  ;;  %v878_v28 = vld [vmem:[#allocation4 + $0x58] sm:$0xff] }
 0x24f   :  { %1422 = vpow2.f32 %v605_v0  ;;  %v572_v24 = vsub.f32 %v1724_v47, %v523_v35 }
 0x250   :  { %v1413_v52 = vpop.eup %1412 }
 0x251   :  { %v1415_v10 = vpop.eup %1414  ;;  %625 = vadd.xlane.f32.xlu0 %v1413_v52  ;;  %v595_v16 = vmul.f32 1.442695, %v572_v24  ;;  %v775_v52 = vsel %vm743_vm5, %v1783_v57, 0.0  ;;  %v777_v24 = vsel %vm745_vm6, %v1733_v50, 0.0  ;;  %v781_v57 = vsel %vm749_vm8, %v1678_v25, 0.0 }
 0x252   :  { %615 = vadd.xlane.f32.xlu1 %v1415_v10  ;;  %v513_v45 = vpop.permute.xlu1 %512  ;;  %v783_v50 = vsel %vm751_vm9, %v1794_v60, 0.0  ;;  %v785_v25 = vsel %vm753_vm10, %v1740_v53, 0.0  ;;  %v778_v60 = vsel %vm746_vm13, %v1724_v47, 0.0  ;;  %v782_v47 = vsel %vm750_vm15, %v1708_v40, 0.0 }
 0x253   :  { %1424 = vpow2.f32 %v595_v16  ;;  %v570_v38 = vsub.f32 %v1745_v54, %v513_v45  ;;  %v779_v16 = vsel %vm747_vm7, %v1705_v39, 0.0  ;;  %v776_v39 = vsel %vm744_vm12, %v1745_v54, 0.0 }
 0x254   :  { %v1417_v17 = vpop.eup %1416  ;;  %1426 = vpow2.f32 %v611_v15  ;;  %v784_v53 = vsel %vm752_vm1, %v1786_v58, 0.0  ;;  %v874_v15 = vld [vmem:[#allocation4 + $0x38] sm:$0xff] }
 0x255   :  { %v1419_v14 = vpop.eup %1418  ;;  %641 = vadd.xlane.f32.xlu0 %v1417_v17  ;;  %v591_v42 = vmul.f32 1.442695, %v570_v38  ;;  %v872_v17 = vld [vmem:[#allocation4 + $0x28] sm:$0xff] }
 0x256   :  { %631 = vadd.xlane.f32.xlu1 %v1419_v14  ;;  %v876_v38 = vld [vmem:[#allocation4 + $0x48] sm:$0xff] }
 0x257   :  { %1428 = vpow2.f32 %v591_v42 }
 0x258   :  { %v1421_v41 = vpop.eup %1420  ;;  %1430 = vpow2.f32 %v607_v19  ;;  %v882_v19 = vld [vmem:[#allocation4 + $0x78] sm:$0xff] }
 0x259   :  { %621 = vadd.xlane.f32.xlu0 %v1421_v41 }
 0x25c   :  { %v1423_v0 = vpop.eup %1422 }
 0x25d   :  { %637 = vadd.xlane.f32.xlu0 %v1423_v0 }
 0x260   :  { %v1425_v35 = vpop.eup %1424 }
 0x261   :  { %795 = vadd.xlane.f32.xlu0 %v775_v52  ;;  %627 = vadd.xlane.f32.xlu1 %v1425_v35  ;;  %v1427_v6 = vpop.eup %1426  ;;  %v756_v52 = vld [vmem:[#allocation5 + $0x8] sm:$0xff] }
 0x264   :  { %v1429_v10 = vpop.eup %1428 }
 0x265   :  { %799 = vadd.xlane.f32.xlu0 %v777_v24  ;;  %643 = vadd.xlane.f32.xlu1 %v1427_v6  ;;  %v1431_v59 = vpop.eup %1430 }
 0x269   :  { %803 = vadd.xlane.f32.xlu0 %v779_v16  ;;  %623 = vadd.xlane.f32.xlu1 %v1429_v10  ;;  %v758_v10 = vld [vmem:[#allocation5 + $0x18] sm:$0xff] }
 0x26d   :  { %807 = vadd.xlane.f32.xlu0 %v781_v57  ;;  %639 = vadd.xlane.f32.xlu1 %v1431_v59  ;;  %v2484_v57 = vsub.f32 %v1850_v9, %v1856_v13 }
 0x271   :  { %811 = vadd.xlane.f32.xlu0 %v783_v50  ;;  %797 = vadd.xlane.f32.xlu1 %v776_v39  ;;  %v425_v50 = vmul.f32 1.442695, %v2484_v57  ;;  %v1003_v39 = vld [vmem:[#allocation2 + $0x10] sm:$0xff] }
 0x273   :  { %v788_v63 = vpop.xlane.xlu0 %787  ;;  %1432 = vpow2.f32 %v425_v50 }
 0x274   :  { %v819_v45 = vadd.f32 %v788_v63, %v755_v61  ;;  %v1035_v61 = vld [vmem:[#allocation4 + $0x10] sm:$0xff]  ;;  %v2485_v63 = vsub.f32 %v1848_v8, %v1853_v12  ;;  %v2487_v8 = vsub.f32 %v1880_v34, %v1894_v44  ;;  %v2490_v34 = vsub.f32 %v1908_v55, %v1913_v2 }
 0x275   :  { %815 = vadd.xlane.f32.xlu0 %v785_v25  ;;  %801 = vadd.xlane.f32.xlu1 %v778_v60  ;;  %v2172_v25 = vmax.f32 %v1003_v39, %v1035_v61  ;;  %v1001_v60 = vld [vmem:[#allocation2] sm:$0xff] }
 0x276   :  { %835 = vst.msk [vmem:[#allocation5] sm:$0xff] %vm44_vm0, %v819_v45  ;;  %v441_v45 = vmul.f32 1.442695, %v2485_v63  ;;  %v437_v12 = vmul.f32 1.442695, %v2487_v8  ;;  %v1007_v8 = vld [vmem:[#allocation2 + $0x30] sm:$0xff] }
 0x277   :  { %v792_v54 = vpop.xlane.xlu0 %791  ;;  %v1067_v9 = vsub.f32 %v1003_v39, %v2172_v25  ;;  %v1131_v13 = vsub.f32 %v1035_v61, %v2172_v25  ;;  %v423_v44 = vmul.f32 1.442695, %v2490_v34  ;;  %v2226_v61 = vld [vmem:[#allocation4 + $0x50] sm:$0xff] }
 0x278   :  { %v821_v3 = vadd.f32 %v792_v54, %v757_v1  ;;  %1434 = vpow2.f32 %v441_v45  ;;  %v1033_v1 = vld [vmem:[#allocation4] sm:$0xff]  ;;  %v2486_v54 = vsub.f32 %v1867_v27, %v1875_v32  ;;  %v2489_v27 = vsub.f32 %v1882_v36, %v1897_v48  ;;  %v2228_v45 = vld [vmem:[#allocation4 + $0x30] sm:$0xff] }
 0x279   :  { %805 = vadd.xlane.f32.xlu1 %v780_v11  ;;  %v2177_v11 = vmax.f32 %v1001_v60, %v1033_v1  ;;  %v2197_v36 = vld [vmem:[#allocation4 + $0x40] sm:$0xff] }
 0x27a   :  { %837 = vst.msk [vmem:[#allocation5 + $0x10] sm:$0xff] %vm44_vm0, %v821_v3  ;;  %v421_v3 = vmul.f32 1.442695, %v2486_v54  ;;  %v443_v32 = vmul.f32 1.442695, %v2489_v27  ;;  %v1011_v54 = vld [vmem:[#allocation2 + $0x50] sm:$0xff] }
 0x27b   :  { %v2236_v27 = vmax.f32 %v1011_v54, %v2226_v61 }
 0x27c   :  { %1436 = vpow2.f32 %v421_v3 }
 0x27d   :  { %809 = vadd.xlane.f32.xlu1 %v782_v47  ;;  %v2488_v47 = vsub.f32 %v1869_v29, %v1878_v33  ;;  %1438 = vpow2.f32 %v437_v12  ;;  %v1002_v33 = vld [vmem:[#allocation2 + $0x8] sm:$0xff]  ;;  %v2501_v12 = vld [vmem:[#allocation16_spill] sm:$0xff] }
 0x281   :  { %813 = vadd.xlane.f32.xlu1 %v784_v53  ;;  %v427_v53 = vmul.f32 1.442695, %v2488_v47  ;;  %v2502_v47 = vld [vmem:[#allocation18_spill] sm:$0xff] }
 0x283   :  { %1440 = vpow2.f32 %v427_v53  ;;  %v2503_v53 = vsub.f32 %v2501_v12, %v2502_v47  ;;  %v1010_v12 = vld [vmem:[#allocation2 + $0x48] sm:$0xff] }
 0x284   :  { %v890_v21 = vpop.xlane.xlu1 %889  ;;  %1442 = vpow2.f32 %v443_v32 }
 0x285   :  { %v918_v31 = vmax.f32 %v870_v5, %v890_v21  ;;  %817 = vadd.xlane.f32.xlu1 %v786_v46  ;;  %v1065_v5 = vsub.f32 %v1001_v60, %v2177_v11  ;;  %v1085_v21 = vmul.f32 1.442695, %v1067_v9  ;;  %v1149_v46 = vmul.f32 1.442695, %v1131_v13 }
 0x287   :  { %934 = vst.msk [vmem:[#allocation4 + $0x18] sm:$0xff] %vm44_vm0, %v918_v31  ;;  %v1129_v31 = vsub.f32 %v1033_v1, %v2177_v11  ;;  %v1081_v29 = vmul.f32 1.442695, %v1065_v5  ;;  %1444 = vpow2.f32 %v1085_v21  ;;  %v429_v5 = vmul.f32 1.442695, %v2503_v53  ;;  %v461_v21 = vld [vmem:[#allocation3 + $0x40] sm:$0xff] }
 0x288   :  { %v894_v40 = vpop.xlane.xlu1 %893  ;;  %1446 = vpow2.f32 %v1149_v46 }
 0x289   :  { %v920_v37 = vmax.f32 %v872_v17, %v894_v40  ;;  %v1034_v17 = vld [vmem:[#allocation4 + $0x8] sm:$0xff]  ;;  %v1433_v40 = vpop.eup %1432  ;;  %v1145_v48 = vmul.f32 1.442695, %v1129_v31  ;;  %1448 = vpow2.f32 %v423_v44  ;;  %v2240_v31 = vmax.f32 %v1007_v8, %v2228_v45 }
 0x28a   :  { %1450 = vpow2.f32 %v1081_v29 }
 0x28b   :  { %936 = vst.msk [vmem:[#allocation4 + $0x28] sm:$0xff] %vm44_vm0, %v920_v37  ;;  %v455_v37 = vld [vmem:[#allocation3 + $0x10] sm:$0xff]  ;;  %1452 = vpow2.f32 %v1145_v48 }
 0x28c   :  { %v898_v49 = vpop.xlane.xlu1 %897  ;;  %v471_v2 = vmul.f32 %v1433_v40, %v455_v37  ;;  %v2244_v40 = vld [vmem:[#allocation4 + $0x20] sm:$0xff] }
 0x28d   :  { %v922_v58 = vmax.f32 %v874_v15, %v898_v49  ;;  %v2195_v15 = vmax.f32 %v1002_v33, %v1034_v17 }
 0x28e   :  { %v1036_v49 = vld [vmem:[#allocation4 + $0x18] sm:$0xff] }
 0x28f   :  { %938 = vst.msk [vmem:[#allocation4 + $0x38] sm:$0xff] %vm44_vm0, %v922_v58  ;;  %v1009_v58 = vld [vmem:[#allocation2 + $0x40] sm:$0xff] }
 0x290   :  { %v902_v14 = vpop.xlane.xlu1 %901 }
 0x291   :  { %v924_v20 = vmax.f32 %v876_v38, %v902_v14  ;;  %v2491_v38 = vsub.f32 %v1910_v56, %v1916_v4  ;;  %v1435_v14 = vpop.eup %1434 }
 0x293   :  { %940 = vst.msk [vmem:[#allocation4 + $0x48] sm:$0xff] %vm44_vm0, %v924_v20  ;;  %v439_v55 = vmul.f32 1.442695, %v2491_v38  ;;  %v1004_v20 = vld [vmem:[#allocation2 + $0x18] sm:$0xff] }
 0x294   :  { %v906_v18 = vpop.xlane.xlu1 %905  ;;  %v2212_v4 = vmax.f32 %v1004_v20, %v1036_v49 }
 0x295   :  { %v926_v51 = vmax.f32 %v878_v28, %v906_v18  ;;  %v2492_v28 = vsub.f32 %v1919_v7, %v1931_v22  ;;  %v2494_v7 = vsub.f32 %v1935_v26, %v1948_v62  ;;  %1454 = vpow2.f32 %v439_v55  ;;  %v453_v62 = vld [vmem:[#allocation3] sm:$0xff] }
 0x296   :  { %v1068_v60 = vsub.f32 %v1004_v20, %v2212_v4  ;;  %v1132_v9 = vsub.f32 %v1036_v49, %v2212_v4  ;;  %v2505_v20 = vld [vmem:[#allocation19_spill] sm:$0xff] }
 0x297   :  { %942 = vst.msk [vmem:[#allocation4 + $0x58] sm:$0xff] %vm44_vm0, %v926_v51  ;;  %v435_v18 = vmul.f32 1.442695, %v2492_v28  ;;  %v2206_v51 = vmax.f32 %v1009_v58, %v2197_v36  ;;  %v451_v22 = vmul.f32 1.442695, %v2494_v7 }
 0x298   :  { %v910_v42 = vpop.xlane.xlu1 %909  ;;  %v1087_v29 = vmul.f32 1.442695, %v1068_v60  ;;  %v1151_v49 = vmul.f32 1.442695, %v1132_v9 }
 0x299   :  { %v928_v41 = vmax.f32 %v880_v30, %v910_v42  ;;  %v463_v42 = vld [vmem:[#allocation3 + $0x50] sm:$0xff]  ;;  %1456 = vpow2.f32 %v435_v18  ;;  %v1073_v39 = vsub.f32 %v1009_v58, %v2206_v51  ;;  %v1137_v48 = vsub.f32 %v2197_v36, %v2206_v51  ;;  %v2507_v36 = vld [vmem:[#allocation20_spill] sm:$0xff] }
 0x29b   :  { %944 = vst.msk [vmem:[#allocation4 + $0x68] sm:$0xff] %vm44_vm0, %v928_v41  ;;  %v1066_v41 = vsub.f32 %v1002_v33, %v2195_v15 }
 0x29c   :  { %v914_v0 = vpop.xlane.xlu1 %913 }
 0x29d   :  { %v930_v35 = vmax.f32 %v882_v19, %v914_v0  ;;  %v2493_v19 = vsub.f32 %v1933_v23, %v1945_v43  ;;  %v1437_v23 = vpop.eup %1436  ;;  %v2498_v43 = vld [vmem:[#allocation13_spill] sm:$0xff]  ;;  %v1083_v63 = vmul.f32 1.442695, %v1066_v41 }
 0x29e   :  { %v1439_v13 = vpop.eup %1438  ;;  %v469_v32 = vmul.f32 %v1437_v23, %v453_v62  ;;  %v1135_v23 = vsub.f32 %v2228_v45, %v2240_v31 }
 0x29f   :  { %946 = vst.msk [vmem:[#allocation4 + $0x78] sm:$0xff] %vm44_vm0, %v930_v35  ;;  %v433_v56 = vmul.f32 1.442695, %v2493_v19  ;;  %v1130_v35 = vsub.f32 %v1034_v17, %v2195_v15  ;;  %v1441_v46 = vpop.eup %1440  ;;  %v1097_v17 = vmul.f32 1.442695, %v1073_v39  ;;  %v477_v38 = vmul.f32 %v1439_v13, %v461_v21  ;;  %v464_v13 = vld [vmem:[#allocation3 + $0x58] sm:$0xff] }
 0x2a0   :  { %v790_v6 = vpop.xlane.xlu1 %789  ;;  %v2242_v44 = vpop.eup %1442  ;;  %v1139_v39 = vsub.f32 %v2226_v61, %v2236_v27  ;;  %v1157_v53 = vmul.f32 1.442695, %v1135_v23 }
 0x2a1   :  { %v820_v24 = vadd.f32 %v790_v6, %v756_v52  ;;  %v2495_v52 = vld [vmem:[#allocation12_spill] sm:$0xff]  ;;  %v2496_v6 = vld [vmem:[#allocation14_spill] sm:$0xff]  ;;  %1458 = vpow2.f32 %v433_v56  ;;  %v1147_v3 = vmul.f32 1.442695, %v1130_v35  ;;  %v1445_v37 = vpop.eup %1444  ;;  %v2508_v56 = vld [vmem:[#allocation21_spill] sm:$0xff] }
 0x2a2   :  { %1460 = vpow2.f32 %v451_v22  ;;  %v1447_v55 = vpop.eup %1446  ;;  %v1071_v22 = vsub.f32 %v1007_v8, %v2240_v31 }
 0x2a3   :  { %836 = vst.msk [vmem:[#allocation5 + $0x8] sm:$0xff] %vm44_vm0, %v820_v24  ;;  %v2497_v24 = vsub.f32 %v2495_v52, %v2496_v6  ;;  %v2255_v19 = vpop.eup %1448  ;;  %v2264_v52 = vld [vmem:[#allocation4 + $0x70] sm:$0xff] }
 0x2a4   :  { %v794_v16 = vpop.xlane.xlu1 %793 }
 0x2a5   :  { %v822_v59 = vadd.f32 %v794_v16, %v758_v10  ;;  %v449_v10 = vmul.f32 1.442695, %v2497_v24  ;;  %v479_v16 = vmul.f32 %v1435_v14, %v463_v42  ;;  %v2504_v14 = vld [vmem:[#allocation17_spill] sm:$0xff]  ;;  %v2252_v42 = vld [vmem:[#allocation4 + $0x60] sm:$0xff]  ;;  %v456_v24 = vld [vmem:[#allocation3 + $0x18] sm:$0xff] }
 0x2a6   :  { %v2506_v28 = vsub.f32 %v2504_v14, %v2505_v20  ;;  %v472_v45 = vmul.f32 %v1441_v46, %v456_v24  ;;  %v1165_v46 = vmul.f32 1.442695, %v1139_v39  ;;  %v2302_v20 = vld [vmem:[#allocation4 + $0x58] sm:$0xff]  ;;  %v467_v39 = vld [vmem:[#allocation3 + $0x70] sm:$0xff] }
 0x2a7   :  { %838 = vst.msk [vmem:[#allocation5 + $0x18] sm:$0xff] %vm44_vm0, %v822_v59  ;;  %v2499_v59 = vld [vmem:[#allocation15_spill] sm:$0xff]  ;;  %1462 = vpow2.f32 %v449_v10  ;;  %v1451_v10 = vpop.eup %1450 }
 0x2a8   :  { %v2500_v57 = vsub.f32 %v2498_v43, %v2499_v59  ;;  %v447_v18 = vmul.f32 1.442695, %v2506_v28  ;;  %v1453_v62 = vpop.eup %1452  ;;  %v459_v28 = vld [vmem:[#allocation3 + $0x30] sm:$0xff] }
 0x2aa   :  { %v431_v50 = vmul.f32 1.442695, %v2500_v57  ;;  %v1015_v57 = vld [vmem:[#allocation2 + $0x70] sm:$0xff] }
 0x2ab   :  { %v2274_v60 = vmax.f32 %v1015_v57, %v2264_v52 }
 0x2ac   :  { %1464 = vpow2.f32 %v431_v50  ;;  %v1161_v50 = vmul.f32 1.442695, %v1137_v48  ;;  %v1008_v48 = vld [vmem:[#allocation2 + $0x38] sm:$0xff] }
 0x2ad   :  { %1466 = vpow2.f32 %v1083_v63 }
 0x2ae   :  { %1468 = vpow2.f32 %v1147_v3  ;;  %v1093_v3 = vmul.f32 1.442695, %v1071_v22 }
 0x2af   :  { %1470 = vpow2.f32 %v429_v5  ;;  %v2286_v5 = vld [vmem:[#allocation4 + $0x38] sm:$0xff] }
 0x2b0   :  { %1472 = vpow2.f32 %v1097_v17  ;;  %v2300_v14 = vmax.f32 %v1008_v48, %v2286_v5 }
 0x2b1   :  { %1474 = vpow2.f32 %v1087_v29 }
 0x2b2   :  { %1476 = vpow2.f32 %v1151_v49 }
 0x2c2   :  { %v618_v30 = vpop.xlane.xlu0 %617 }
 0x2c3   :  { %v647_v0 = vadd.f32 %v618_v30, %v471_v2  ;;  %v1005_v2 = vld [vmem:[#allocation2 + $0x20] sm:$0xff]  ;;  %v1075_v30 = vsub.f32 %v1011_v54, %v2236_v27  ;;  %v2279_v54 = vpop.eup %1454 }
 0x2c4   :  { %v2261_v7 = vmax.f32 %v1005_v2, %v2244_v40  ;;  %v2282_v8 = vpop.eup %1456 }
 0x2c5   :  { %664 = vst.msk [vmem:[#allocation3 + $0x10] sm:$0xff] %vm44_vm0, %v647_v0  ;;  %v2509_v0 = vsub.f32 %v2507_v36, %v2508_v56  ;;  %v1101_v63 = vmul.f32 1.442695, %v1075_v30  ;;  %v1459_v21 = vpop.eup %1458 }
 0x2c6   :  { %v634_v26 = vpop.xlane.xlu0 %633  ;;  %v1069_v61 = vsub.f32 %v1005_v2, %v2261_v7  ;;  %v1133_v47 = vsub.f32 %v2244_v40, %v2261_v7  ;;  %v1079_v40 = vsub.f32 %v1015_v57, %v2274_v60  ;;  %v1143_v2 = vsub.f32 %v2264_v52, %v2274_v60 }
 0x2c7   :  { %v655_v1 = vadd.f32 %v634_v26, %v479_v16  ;;  %v445_v35 = vmul.f32 1.442695, %v2509_v0  ;;  %v1013_v16 = vld [vmem:[#allocation2 + $0x60] sm:$0xff]  ;;  %v1012_v0 = vld [vmem:[#allocation2 + $0x58] sm:$0xff]  ;;  %v475_v23 = vmul.f32 %v1459_v21, %v459_v28  ;;  %v1072_v57 = vsub.f32 %v1008_v48, %v2300_v14 }
 0x2c8   :  { %v2271_v26 = vmax.f32 %v1013_v16, %v2252_v42  ;;  %v1153_v30 = vmul.f32 1.442695, %v1133_v47  ;;  %v2326_v48 = vld [vmem:[#allocation4 + $0x78] sm:$0xff] }
 0x2c9   :  { %672 = vst.msk [vmem:[#allocation3 + $0x50] sm:$0xff] %vm44_vm0, %v655_v1  ;;  %v2276_v1 = vld [vmem:[#allocation4 + $0x48] sm:$0xff] }
 0x2ca   :  { %v614_v34 = vpop.xlane.xlu0 %613  ;;  %v1077_v17 = vsub.f32 %v1013_v16, %v2271_v26  ;;  %v2313_v16 = vmax.f32 %v1012_v0, %v2302_v20 }
 0x2cb   :  { %v645_v33 = vadd.f32 %v614_v34, %v469_v32  ;;  %v2290_v34 = vmax.f32 %v1010_v12, %v2276_v1 }
 0x2cc   :  { %v1019_v58 = vld [vmem:[#allocation3 + $0x10] sm:$0xff] }
 0x2cd   :  { %v1115_v41 = vmul.f32 %v1445_v37, %v1019_v58  ;;  %662 = vst.msk [vmem:[#allocation3] sm:$0xff] %vm44_vm0, %v645_v33  ;;  %v454_v33 = vld [vmem:[#allocation3 + $0x8] sm:$0xff]  ;;  %v2292_v37 = vpop.eup %1460  ;;  %v480_v58 = vmul.f32 %v2242_v44, %v464_v13  ;;  %v1074_v22 = vsub.f32 %v1010_v12, %v2290_v34  ;;  %v1138_v13 = vsub.f32 %v2276_v1, %v2290_v34 }
 0x2ce   :  { %v630_v6 = vpop.xlane.xlu0 %629  ;;  %v470_v44 = vmul.f32 %v2255_v19, %v454_v33  ;;  %v1141_v19 = vsub.f32 %v2252_v42, %v2271_v26  ;;  %v1136_v33 = vsub.f32 %v2286_v5, %v2300_v14  ;;  %v1140_v5 = vsub.f32 %v2302_v20, %v2313_v16 }
 0x2cf   :  { %v1179_v43 = vadd.f32 %v1447_v55, %v1115_v41  ;;  %v653_v59 = vadd.f32 %v630_v6, %v477_v38  ;;  %v1463_v38 = vpop.eup %1462  ;;  %v1089_v55 = vmul.f32 1.442695, %v1069_v61  ;;  %v462_v6 = vld [vmem:[#allocation3 + $0x48] sm:$0xff] }
 0x2d0   :  { %v478_v61 = vmul.f32 %v2279_v54, %v462_v6  ;;  %v1095_v54 = vmul.f32 1.442695, %v1072_v57  ;;  %v1159_v20 = vmul.f32 1.442695, %v1136_v33 }
 0x2d1   :  { %1478 = vlog2.f32 %v1179_v43  ;;  %670 = vst.msk [vmem:[#allocation3 + $0x40] sm:$0xff] %vm44_vm0, %v653_v59  ;;  %v1173_v59 = vmul.f32 1.442695, %v1143_v2 }
 0x2d2   :  { %1480 = vpow2.f32 %v447_v18  ;;  %v620_v9 = vpop.xlane.xlu1 %619  ;;  %v2304_v18 = vpop.eup %1464 }
 0x2d3   :  { %1482 = vpow2.f32 %v445_v35  ;;  %v648_v32 = vadd.f32 %v620_v9, %v472_v45  ;;  %v2307_v56 = vpop.eup %1466  ;;  %v1105_v35 = vmul.f32 1.442695, %v1077_v17  ;;  %v1099_v9 = vmul.f32 1.442695, %v1074_v22 }
 0x2d4   :  { %1484 = vpow2.f32 %v1161_v50  ;;  %v1017_v29 = vld [vmem:[#allocation3] sm:$0xff]  ;;  %v2310_v24 = vpop.eup %1468 }
 0x2d5   :  { %1486 = vpow2.f32 %v1101_v63  ;;  %v1113_v49 = vmul.f32 %v1451_v10, %v1017_v29  ;;  %665 = vst.msk [vmem:[#allocation3 + $0x18] sm:$0xff] %vm44_vm0, %v648_v32  ;;  %v1109_v10 = vmul.f32 1.442695, %v1079_v40  ;;  %v1471_v43 = vpop.eup %1470  ;;  %v1076_v32 = vsub.f32 %v1012_v0, %v2313_v16  ;;  %v1027_v0 = vld [vmem:[#allocation3 + $0x50] sm:$0xff] }
 0x2d6   :  { %1488 = vpow2.f32 %v1093_v3  ;;  %v636_v36 = vpop.xlane.xlu1 %635  ;;  %v1169_v29 = vmul.f32 1.442695, %v1141_v19 }
 0x2d7   :  { %1490 = vpow2.f32 %v1157_v53  ;;  %v1177_v41 = vadd.f32 %v1453_v62, %v1113_v49  ;;  %v656_v52 = vadd.f32 %v636_v36, %v480_v58  ;;  %v1473_v62 = vpop.eup %1472  ;;  %v2331_v49 = vld [vmem:[#allocation4 + $0x28] sm:$0xff]  ;;  %v1016_v36 = vld [vmem:[#allocation2 + $0x78] sm:$0xff]  ;;  %v1103_v6 = vmul.f32 1.442695, %v1076_v32 }
 0x2d8   :  { %1492 = vpow2.f32 %v1165_v46  ;;  %v1475_v3 = vpop.eup %1474  ;;  %v1025_v42 = vld [vmem:[#allocation3 + $0x40] sm:$0xff]  ;;  %v483_v46 = vmul.f32 %v1463_v38, %v467_v39 }
 0x2d9   :  { %1494 = vlog2.f32 %v1177_v41  ;;  %673 = vst.msk [vmem:[#allocation3 + $0x58] sm:$0xff] %vm44_vm0, %v656_v52  ;;  %v1477_v53 = vpop.eup %1476  ;;  %v1006_v52 = vld [vmem:[#allocation2 + $0x28] sm:$0xff]  ;;  %v465_v39 = vld [vmem:[#allocation3 + $0x60] sm:$0xff] }
 0x2da   :  { %1496 = vpow2.f32 %v1089_v55  ;;  %v626_v50 = vpop.xlane.xlu0 %625  ;;  %v1121_v55 = vmul.f32 %v1473_v62, %v1025_v42  ;;  %v2341_v57 = vmax.f32 %v1006_v52, %v2331_v49 }
 0x2db   :  { %1498 = vpow2.f32 %v1153_v30  ;;  %v616_v63 = vpop.xlane.xlu1 %615  ;;  %v651_v45 = vadd.f32 %v626_v50, %v475_v23  ;;  %v457_v30 = vld [vmem:[#allocation3 + $0x20] sm:$0xff] }
 0x2dc   :  { %1500 = vpow2.f32 %v1105_v35  ;;  %v1020_v12 = vld [vmem:[#allocation3 + $0x18] sm:$0xff]  ;;  %v646_v47 = vadd.f32 %v616_v63, %v470_v44  ;;  %v1163_v44 = vmul.f32 1.442695, %v1138_v13  ;;  %v473_v50 = vmul.f32 %v1471_v43, %v457_v30 }
 0x2dd   :  { %1502 = vpow2.f32 %v1109_v10  ;;  %v1116_v21 = vmul.f32 %v1475_v3, %v1020_v12  ;;  %668 = vst.msk [vmem:[#allocation3 + $0x30] sm:$0xff] %vm44_vm0, %v651_v45  ;;  %v2336_v10 = vmax.f32 %v1016_v36, %v2326_v48 }
 0x2de   :  { %v1479_v17 = vpop.eup %1478  ;;  %1504 = vpow2.f32 %v1173_v59  ;;  %663 = vst.msk [vmem:[#allocation3 + $0x8] sm:$0xff] %vm44_vm0, %v646_v47  ;;  %v642_v1 = vpop.xlane.xlu0 %641  ;;  %v1243_v59 = vld [vmem:[#allocation5 + $0x10] sm:$0xff]  ;;  %v2344_v47 = vld [vmem:[#allocation4 + $0x68] sm:$0xff] }
 0x2df   :  { %v2329_v40 = vpop.eup %1480  ;;  %v1198_v58 = vmul.f32 0.6931472, %v1479_v17  ;;  %v1180_v2 = vadd.f32 %v1477_v53, %v1116_v21  ;;  %v632_v38 = vpop.xlane.xlu1 %631  ;;  %v659_v28 = vadd.f32 %v642_v1, %v483_v46  ;;  %1506 = vpow2.f32 %v1099_v9  ;;  %v1014_v1 = vld [vmem:[#allocation2 + $0x68] sm:$0xff] }
 0x2e0   :  { %v1483_v41 = vpop.eup %1482  ;;  %v654_v35 = vadd.f32 %v632_v38, %v478_v61  ;;  %v1167_v9 = vmul.f32 1.442695, %v1140_v5  ;;  %v1080_v53 = vsub.f32 %v1016_v36, %v2336_v10  ;;  %v1070_v17 = vsub.f32 %v1006_v52, %v2341_v57 }
 0x2e1   :  { %v1485_v22 = vpop.eup %1484  ;;  %v1227_v23 = vadd.f32 %v1198_v58, %v2172_v25  ;;  %1508 = vlog2.f32 %v1180_v2  ;;  %676 = vst.msk [vmem:[#allocation3 + $0x70] sm:$0xff] %vm44_vm0, %v659_v28  ;;  %v481_v21 = vmul.f32 %v1483_v41, %v465_v39  ;;  %v460_v28 = vld [vmem:[#allocation3 + $0x38] sm:$0xff]  ;;  %v2357_v41 = vmax.f32 %v1014_v1, %v2344_v47 }
 0x2e2   :  { %v1487_v19 = vpop.eup %1486  ;;  %1510 = vpow2.f32 %v1169_v29  ;;  %671 = vst.msk [vmem:[#allocation3 + $0x48] sm:$0xff] %vm44_vm0, %v654_v35  ;;  %v1185_v61 = vadd.f32 %v1485_v22, %v1121_v55  ;;  %v622_v25 = vpop.xlane.xlu0 %621  ;;  %v1134_v29 = vsub.f32 %v2331_v49, %v2341_v57  ;;  %v1111_v5 = vmul.f32 1.442695, %v1080_v53  ;;  %v759_v22 = vld [vmem:[#allocation5 + $0x20] sm:$0xff] }
 0x2e3   :  { %v1489_v62 = vpop.eup %1488  ;;  %1512 = vpow2.f32 %v1095_v54  ;;  %v1259_v63 = vsub.f32 %v1227_v23, %v1243_v59  ;;  %v1123_v45 = vmul.f32 %v1487_v19, %v1027_v0  ;;  %v649_v42 = vadd.f32 %v622_v25, %v473_v50 }
 0x2e4   :  { %v1491_v3 = vpop.eup %1490  ;;  %1514 = vpow2.f32 %v1163_v44  ;;  %v1023_v13 = vld [vmem:[#allocation3 + $0x30] sm:$0xff]  ;;  %v1144_v0 = vsub.f32 %v2326_v48, %v2336_v10  ;;  %v1091_v23 = vmul.f32 1.442695, %v1070_v17  ;;  %v476_v19 = vmul.f32 %v2282_v8, %v460_v28  ;;  %v468_v48 = vld [vmem:[#allocation3 + $0x78] sm:$0xff] }
 0x2e5   :  { %v1493_v12 = vpop.eup %1492  ;;  %1516 = vpow2.f32 %v1103_v6  ;;  %1275 = vst.msk [vmem:[%s2463_s2 + $0x10] sm:$0xff] %vm44_vm0, %v1259_v63  ;;  %v1018_v43 = vld [vmem:[#allocation3 + $0x8] sm:$0xff]  ;;  %v1119_v32 = vmul.f32 %v1489_v62, %v1023_v13  ;;  %666 = vst.msk [vmem:[#allocation3 + $0x20] sm:$0xff] %vm44_vm0, %v649_v42  ;;  %v1241_v6 = vld [vmem:[#allocation5] sm:$0xff]  ;;  %v1155_v59 = vmul.f32 1.442695, %v1134_v29  ;;  %v484_v53 = vmul.f32 %v2292_v37, %v468_v48 }
 0x2e6   :  { %v1495_v46 = vpop.eup %1494  ;;  %1518 = vpow2.f32 %v1159_v20  ;;  %v1114_v54 = vmul.f32 %v2307_v56, %v1018_v43  ;;  %v1187_v58 = vadd.f32 %v1493_v12, %v1123_v45  ;;  %v638_v38 = vpop.xlane.xlu0 %637  ;;  %v761_v13 = vld [vmem:[#allocation5 + $0x30] sm:$0xff]  ;;  %v458_v29 = vld [vmem:[#allocation3 + $0x28] sm:$0xff] }
 0x2e7   :  { %v1497_v33 = vpop.eup %1496  ;;  %v1194_v55 = vmul.f32 0.6931472, %v1495_v46  ;;  %1520 = vlog2.f32 %v1185_v61  ;;  %v1183_v2 = vadd.f32 %v1491_v3, %v1119_v32  ;;  %v657_v44 = vadd.f32 %v638_v38, %v481_v21 }
 0x2e8   :  { %v1499_v30 = vpop.eup %1498  ;;  %1522 = vpow2.f32 %v1167_v9  ;;  %v1178_v49 = vadd.f32 %v2310_v24, %v1114_v54  ;;  %v1031_v36 = vld [vmem:[#allocation3 + $0x70] sm:$0xff]  ;;  %v1142_v3 = vsub.f32 %v2344_v47, %v2357_v41  ;;  %v1175_v9 = vmul.f32 1.442695, %v1144_v0 }
 0x2e9   :  { %v1501_v56 = vpop.eup %1500  ;;  %v1225_v35 = vadd.f32 %v1194_v55, %v2177_v11  ;;  %1524 = vlog2.f32 %v1183_v2  ;;  %674 = vst.msk [vmem:[#allocation3 + $0x60] sm:$0xff] %vm44_vm0, %v657_v44  ;;  %v1078_v11 = vsub.f32 %v1014_v1, %v2357_v41  ;;  %v1026_v63 = vld [vmem:[#allocation3 + $0x48] sm:$0xff] }
 0x2ea   :  { %v1503_v52 = vpop.eup %1502  ;;  %1526 = vlog2.f32 %v1178_v49  ;;  %v628_v39 = vpop.xlane.xlu1 %627  ;;  %v1171_v28 = vmul.f32 1.442695, %v1142_v3 }
 0x2eb   :  { %v1505_v24 = vpop.eup %1504  ;;  %1528 = vlog2.f32 %v1187_v58  ;;  %v1257_v20 = vsub.f32 %v1225_v35, %v1241_v6  ;;  %v1127_v50 = vmul.f32 %v1503_v52, %v1031_v36  ;;  %v796_v62 = vpop.xlane.xlu0 %795  ;;  %v652_v45 = vadd.f32 %v628_v39, %v476_v19  ;;  %v1028_v58 = vld [vmem:[#allocation3 + $0x58] sm:$0xff]  ;;  %v763_v36 = vld [vmem:[#allocation5 + $0x40] sm:$0xff]  ;;  %v765_v39 = vld [vmem:[#allocation5 + $0x50] sm:$0xff] }
 0x2ec   :  { %v823_v61 = vadd.f32 %v796_v62, %v759_v22  ;;  %v1507_v25 = vpop.eup %1506  ;;  %1530 = vpow2.f32 %v1111_v5  ;;  %v1021_v8 = vld [vmem:[#allocation3 + $0x20] sm:$0xff]  ;;  %v1107_v1 = vmul.f32 1.442695, %v1078_v11  ;;  %v1244_v5 = vld [vmem:[#allocation5 + $0x18] sm:$0xff]  ;;  %v474_v35 = vmul.f32 %v2304_v18, %v458_v29 }
 0x2ed   :  { %1273 = vst.msk [vmem:[%s2463_s2] sm:$0xff] %vm44_vm0, %v1257_v20  ;;  %1532 = vpow2.f32 %v1091_v23  ;;  %v1117_v12 = vmul.f32 %v1497_v33, %v1021_v8  ;;  %669 = vst.msk [vmem:[#allocation3 + $0x38] sm:$0xff] %vm44_vm0, %v652_v45  ;;  %v1122_v32 = vmul.f32 %v1507_v25, %v1026_v63  ;;  %v1191_v21 = vadd.f32 %v1505_v24, %v1127_v50 }
 0x2ee   :  { %v1509_v42 = vpop.eup %1508  ;;  %839 = vst.msk [vmem:[#allocation5 + $0x20] sm:$0xff] %vm44_vm0, %v823_v61  ;;  %1534 = vpow2.f32 %v1155_v59  ;;  %v644_v46 = vpop.xlane.xlu1 %643 }
 0x2ef   :  { %v1511_v43 = vpop.eup %1510  ;;  %v1200_v47 = vmul.f32 0.6931472, %v1509_v42  ;;  %v800_v17 = vpop.xlane.xlu0 %799  ;;  %v1181_v55 = vadd.f32 %v1499_v30, %v1117_v12  ;;  %v660_v2 = vadd.f32 %v644_v46, %v484_v53  ;;  %1536 = vpow2.f32 %v1175_v9 }
 0x2f0   :  { %v1513_v54 = vpop.eup %1512  ;;  %v825_v33 = vadd.f32 %v800_v17, %v761_v13  ;;  %v1029_v37 = vld [vmem:[#allocation3 + $0x60] sm:$0xff] }
 0x2f1   :  { %v1515_v38 = vpop.eup %1514  ;;  %v1228_v49 = vadd.f32 %v1200_v47, %v2212_v4  ;;  %1538 = vlog2.f32 %v1181_v55  ;;  %v1125_v0 = vmul.f32 %v1501_v56, %v1029_v37  ;;  %677 = vst.msk [vmem:[#allocation3 + $0x78] sm:$0xff] %vm44_vm0, %v660_v2  ;;  %v466_v4 = vld [vmem:[#allocation3 + $0x68] sm:$0xff]  ;;  %v762_v37 = vld [vmem:[#allocation5 + $0x38] sm:$0xff] }
 0x2f2   :  { %v1517_v44 = vpop.eup %1516  ;;  %841 = vst.msk [vmem:[#allocation5 + $0x30] sm:$0xff] %vm44_vm0, %v825_v33  ;;  %v1186_v6 = vadd.f32 %v1515_v38, %v1122_v32  ;;  %1540 = vlog2.f32 %v1191_v21  ;;  %v624_v23 = vpop.xlane.xlu1 %623  ;;  %v482_v11 = vmul.f32 %v2329_v40, %v466_v4  ;;  %v760_v32 = vld [vmem:[#allocation5 + $0x28] sm:$0xff]  ;;  %v767_v21 = vld [vmem:[#allocation5 + $0x60] sm:$0xff] }
 0x2f3   :  { %v1519_v30 = vpop.eup %1518  ;;  %v1260_v22 = vsub.f32 %v1228_v49, %v1244_v5  ;;  %v1124_v52 = vmul.f32 %v1517_v44, %v1028_v58  ;;  %v804_v19 = vpop.xlane.xlu0 %803  ;;  %1542 = vpow2.f32 %v1107_v1  ;;  %v1189_v59 = vadd.f32 %v1511_v43, %v1125_v0  ;;  %v769_v5 = vld [vmem:[#allocation5 + $0x70] sm:$0xff] }
 0x2f4   :  { %v1521_v24 = vpop.eup %1520  ;;  %v650_v20 = vadd.f32 %v624_v23, %v474_v35  ;;  %v827_v50 = vadd.f32 %v804_v19, %v763_v36  ;;  %1544 = vpow2.f32 %v1171_v28  ;;  %v1024_v18 = vld [vmem:[#allocation3 + $0x38] sm:$0xff] }
 0x2f5   :  { %v1523_v56 = vpop.eup %1522  ;;  %1276 = vst.msk [vmem:[%s2463_s2 + $0x18] sm:$0xff] %vm44_vm0, %v1260_v22  ;;  %1546 = vlog2.f32 %v1189_v59  ;;  %v1120_v48 = vmul.f32 %v1513_v54, %v1024_v18  ;;  %v1210_v25 = vmul.f32 0.6931472, %v1521_v24  ;;  %v1242_v54 = vld [vmem:[#allocation5 + $0x8] sm:$0xff] }
 0x2f6   :  { %v1525_v62 = vpop.eup %1524  ;;  %667 = vst.msk [vmem:[#allocation3 + $0x28] sm:$0xff] %vm44_vm0, %v650_v20  ;;  %843 = vst.msk [vmem:[#allocation5 + $0x40] sm:$0xff] %vm44_vm0, %v827_v50  ;;  %v1188_v45 = vadd.f32 %v1523_v56, %v1124_v52  ;;  %1548 = vlog2.f32 %v1186_v6  ;;  %v640_v3 = vpop.xlane.xlu1 %639 }
 0x2f7   :  { %v1527_v63 = vpop.eup %1526  ;;  %v1206_v61 = vmul.f32 0.6931472, %v1525_v62  ;;  %v808_v9 = vpop.xlane.xlu0 %807  ;;  %v1184_v42 = vadd.f32 %v1519_v30, %v1120_v48  ;;  %v658_v12 = vadd.f32 %v640_v3, %v482_v11  ;;  %v1233_v28 = vadd.f32 %v1210_v25, %v2206_v51 }
 0x2f8   :  { %v1529_v8 = vpop.eup %1528  ;;  %v1196_v13 = vmul.f32 0.6931472, %v1527_v63  ;;  %v829_v53 = vadd.f32 %v808_v9, %v765_v39  ;;  %v1032_v43 = vld [vmem:[#allocation3 + $0x78] sm:$0xff]  ;;  %v764_v39 = vld [vmem:[#allocation5 + $0x48] sm:$0xff] }
 0x2f9   :  { %v1231_v47 = vadd.f32 %v1206_v61, %v2240_v31  ;;  %v1531_v46 = vpop.eup %1530  ;;  %1550 = vlog2.f32 %v1184_v42  ;;  %v1247_v17 = vld [vmem:[#allocation5 + $0x30] sm:$0xff]  ;;  %675 = vst.msk [vmem:[#allocation3 + $0x68] sm:$0xff] %vm44_vm0, %v658_v12  ;;  %v1214_v55 = vmul.f32 0.6931472, %v1529_v8  ;;  %v766_v42 = vld [vmem:[#allocation5 + $0x58] sm:$0xff] }
 0x2fa   :  { %v1226_v40 = vadd.f32 %v1196_v13, %v2195_v15  ;;  %845 = vst.msk [vmem:[#allocation5 + $0x50] sm:$0xff] %vm44_vm0, %v829_v53  ;;  %v1533_v29 = vpop.eup %1532  ;;  %1552 = vlog2.f32 %v1188_v45  ;;  %v1128_v1 = vmul.f32 %v1531_v46, %v1032_v43  ;;  %v798_v2 = vpop.xlane.xlu1 %797  ;;  %v1245_v45 = vld [vmem:[#allocation5 + $0x20] sm:$0xff] }
 0x2fb   :  { %v1263_v58 = vsub.f32 %v1231_v47, %v1247_v17  ;;  %v812_v33 = vpop.xlane.xlu0 %811  ;;  %v1535_v31 = vpop.eup %1534  ;;  %v824_v49 = vadd.f32 %v798_v2, %v760_v32  ;;  %v1235_v52 = vadd.f32 %v1214_v55, %v2236_v27 }
 0x2fc   :  { %v1258_v38 = vsub.f32 %v1226_v40, %v1242_v54  ;;  %v831_v15 = vadd.f32 %v812_v33, %v767_v21  ;;  %v1537_v0 = vpop.eup %1536 }
 0x2fd   :  { %1279 = vst.msk [vmem:[%s2463_s2 + $0x30] sm:$0xff] %vm44_vm0, %v1263_v58  ;;  %v1022_v36 = vld [vmem:[#allocation3 + $0x28] sm:$0xff]  ;;  %v1249_v44 = vld [vmem:[#allocation5 + $0x40] sm:$0xff]  ;;  %840 = vst.msk [vmem:[#allocation5 + $0x28] sm:$0xff] %vm44_vm0, %v824_v49  ;;  %v1192_v22 = vadd.f32 %v1537_v0, %v1128_v1 }
 0x2fe   :  { %1274 = vst.msk [vmem:[%s2463_s2 + $0x8] sm:$0xff] %vm44_vm0, %v1258_v38  ;;  %v1118_v35 = vmul.f32 %v1533_v29, %v1022_v36  ;;  %v1265_v30 = vsub.f32 %v1233_v28, %v1249_v44  ;;  %847 = vst.msk [vmem:[#allocation5 + $0x60] sm:$0xff] %vm44_vm0, %v831_v15  ;;  %v1539_v51 = vpop.eup %1538  ;;  %v802_v6 = vpop.xlane.xlu1 %801  ;;  %v768_v1 = vld [vmem:[#allocation5 + $0x68] sm:$0xff]  ;;  %v770_v49 = vld [vmem:[#allocation5 + $0x78] sm:$0xff] }
 0x2ff   :  { %v816_v23 = vpop.xlane.xlu0 %815  ;;  %v1541_v19 = vpop.eup %1540  ;;  %v1202_v4 = vmul.f32 0.6931472, %v1539_v51  ;;  %v826_v59 = vadd.f32 %v802_v6, %v762_v37 }
 0x300   :  { %v1182_v24 = vadd.f32 %v1535_v31, %v1118_v35  ;;  %1281 = vst.msk [vmem:[%s2463_s2 + $0x40] sm:$0xff] %vm44_vm0, %v1265_v30  ;;  %v833_v20 = vadd.f32 %v816_v23, %v769_v5  ;;  %v1543_v50 = vpop.eup %1542  ;;  %v1030_v56 = vld [vmem:[#allocation3 + $0x68] sm:$0xff]  ;;  %v1222_v61 = vmul.f32 0.6931472, %v1541_v19 }
 0x301   :  { %v1251_v18 = vld [vmem:[#allocation5 + $0x50] sm:$0xff]  ;;  %v1545_v62 = vpop.eup %1544  ;;  %v1229_v48 = vadd.f32 %v1202_v4, %v2261_v7  ;;  %v1126_v27 = vmul.f32 %v1543_v50, %v1030_v56  ;;  %842 = vst.msk [vmem:[#allocation5 + $0x38] sm:$0xff] %vm44_vm0, %v826_v59 }
 0x302   :  { %1554 = vlog2.f32 %v1182_v24  ;;  %v1267_v11 = vsub.f32 %v1235_v52, %v1251_v18  ;;  %849 = vst.msk [vmem:[#allocation5 + $0x70] sm:$0xff] %vm44_vm0, %v833_v20  ;;  %v1547_v63 = vpop.eup %1546  ;;  %v806_v25 = vpop.xlane.xlu1 %805  ;;  %v1239_v47 = vadd.f32 %v1222_v61, %v2274_v60 }
 0x303   :  { %1556 = vlog2.f32 %v1192_v22  ;;  %v1549_v3 = vpop.eup %1548  ;;  %v1261_v9 = vsub.f32 %v1229_v48, %v1245_v45  ;;  %v1190_v8 = vadd.f32 %v1545_v62, %v1126_v27  ;;  %v1218_v7 = vmul.f32 0.6931472, %v1547_v63 }
 0x304   :  { %1283 = vst.msk [vmem:[%s2463_s2 + $0x50] sm:$0xff] %vm44_vm0, %v1267_v11  ;;  %v828_v13 = vadd.f32 %v806_v25, %v764_v39  ;;  %v1212_v17 = vmul.f32 0.6931472, %v1549_v3  ;;  %v1246_v22 = vld [vmem:[#allocation5 + $0x28] sm:$0xff] }
 0x305   :  { %1277 = vst.msk [vmem:[%s2463_s2 + $0x20] sm:$0xff] %vm44_vm0, %v1261_v9  ;;  %1558 = vlog2.f32 %v1190_v8  ;;  %v1237_v12 = vadd.f32 %v1218_v7, %v2271_v26  ;;  %v1253_v43 = vld [vmem:[#allocation5 + $0x60] sm:$0xff] }
 0x306   :  { %844 = vst.msk [vmem:[#allocation5 + $0x48] sm:$0xff] %vm44_vm0, %v828_v13  ;;  %v1551_v53 = vpop.eup %1550  ;;  %v810_v32 = vpop.xlane.xlu1 %809  ;;  %v1234_v33 = vadd.f32 %v1212_v17, %v2290_v34 }
 0x307   :  { %v1553_v21 = vpop.eup %1552  ;;  %v1269_v46 = vsub.f32 %v1237_v12, %v1253_v43  ;;  %v1208_v40 = vmul.f32 0.6931472, %v1551_v53  ;;  %v830_v29 = vadd.f32 %v810_v32, %v766_v42 }
 0x308   :  { %v1248_v55 = vld [vmem:[#allocation5 + $0x38] sm:$0xff]  ;;  %v1216_v31 = vmul.f32 0.6931472, %v1553_v21 }
 0x309   :  { %v1255_v54 = vld [vmem:[#allocation5 + $0x70] sm:$0xff]  ;;  %1285 = vst.msk [vmem:[%s2463_s2 + $0x60] sm:$0xff] %vm44_vm0, %v1269_v46  ;;  %v1232_v26 = vadd.f32 %v1208_v40, %v2300_v14  ;;  %846 = vst.msk [vmem:[#allocation5 + $0x58] sm:$0xff] %vm44_vm0, %v830_v29 }
 0x30a   :  { %v1271_v58 = vsub.f32 %v1239_v47, %v1255_v54  ;;  %v814_v60 = vpop.xlane.xlu1 %813  ;;  %v1236_v34 = vadd.f32 %v1216_v31, %v2313_v16 }
 0x30b   :  { %v1264_v2 = vsub.f32 %v1232_v26, %v1248_v55  ;;  %v832_v38 = vadd.f32 %v814_v60, %v768_v1 }
 0x30c   :  { %1287 = vst.msk [vmem:[%s2463_s2 + $0x70] sm:$0xff] %vm44_vm0, %v1271_v58 }
 0x30d   :  { %v1250_v28 = vld [vmem:[#allocation5 + $0x48] sm:$0xff]  ;;  %1280 = vst.msk [vmem:[%s2463_s2 + $0x38] sm:$0xff] %vm44_vm0, %v1264_v2  ;;  %848 = vst.msk [vmem:[#allocation5 + $0x68] sm:$0xff] %vm44_vm0, %v832_v38 }
 0x30e   :  { %v1266_v14 = vsub.f32 %v1234_v33, %v1250_v28  ;;  %v818_v37 = vpop.xlane.xlu1 %817 }
 0x30f   :  { %v1555_v15 = vpop.eup %1554  ;;  %v834_v5 = vadd.f32 %v818_v37, %v770_v49 }
 0x310   :  { %v1557_v36 = vpop.eup %1556  ;;  %v1204_v44 = vmul.f32 0.6931472, %v1555_v15  ;;  %1282 = vst.msk [vmem:[%s2463_s2 + $0x48] sm:$0xff] %vm44_vm0, %v1266_v14  ;;  %v1252_v0 = vld [vmem:[#allocation5 + $0x58] sm:$0xff] }
 0x311   :  { %v1268_v30 = vsub.f32 %v1236_v34, %v1252_v0  ;;  %850 = vst.msk [vmem:[#allocation5 + $0x78] sm:$0xff] %vm44_vm0, %v834_v5  ;;  %v1224_v23 = vmul.f32 0.6931472, %v1557_v36 }
 0x312   :  { %v1230_v35 = vadd.f32 %v1204_v44, %v2341_v57  ;;  %v1559_v51 = vpop.eup %1558 }
 0x313   :  { %1284 = vst.msk [vmem:[%s2463_s2 + $0x58] sm:$0xff] %vm44_vm0, %v1268_v30  ;;  %v1220_v6 = vmul.f32 0.6931472, %v1559_v51  ;;  %v1240_v4 = vadd.f32 %v1224_v23, %v2336_v10 }
 0x314   :  { %v1262_v52 = vsub.f32 %v1230_v35, %v1246_v22  ;;  %v1254_v57 = vld [vmem:[#allocation5 + $0x68] sm:$0xff] }
 0x315   :  { %v1238_v16 = vadd.f32 %v1220_v6, %v2357_v41 }
 0x316   :  { %1278 = vst.msk [vmem:[%s2463_s2 + $0x28] sm:$0xff] %vm44_vm0, %v1262_v52 }
 0x317   :  { %v1270_v19 = vsub.f32 %v1238_v16, %v1254_v57 }
 0x318   :  { %v1256_v24 = vld [vmem:[#allocation5 + $0x78] sm:$0xff] }
 0x319   :  { %1286 = vst.msk [vmem:[%s2463_s2 + $0x68] sm:$0xff] %vm44_vm0, %v1270_v19  ;;  %v1272_v59 = vsub.f32 %v1240_v4, %v1256_v24 }
 0x31b   :  { %1288 = vst.msk [vmem:[%s2463_s2 + $0x78] sm:$0xff] %vm44_vm0, %v1272_v59 }
 0x31c   :  { %1293 = vsyncpa [#allocation7], 1 }
 0x31d   :  { %1294 = vsyncpa [#allocation9], 1 }

</bundles_post_ra>
